<compile_context>
chip_gen: v7x
topology: tpu7x:2x2x1
jax: 0.10.0
libtpu: 0.0.40
codegen_flags: <defaults>
</compile_context>

<pallas_src>
import jax
import jax.numpy as jnp
from jax import lax
from jax.experimental import pallas as pl
from jax.experimental.pallas import tpu as pltpu


# ---------------------------------------------------------------------------
# Fused Pallas kernel
# ---------------------------------------------------------------------------
def make_bilstm_kernel(num_layers, S, B, H):
    """Build the fused forward kernel for a given (static) problem size."""
    H2, H8 = 2 * H, 8 * H

    def kernel(*refs):
        # ---- unpack refs: inputs, output, scratch ----
        x_ref = refs[0]                                   # (S*B, E), time-major rows t*B+b
        layer_refs = [refs[1 + 3 * l: 4 + 3 * l] for l in range(num_layers)]
        fc1_w_ref, fc1_b_ref, fc2_w_ref, fc2_b_ref = \
            refs[1 + 3 * num_layers: 5 + 3 * num_layers]
        out_ref = refs[5 + 3 * num_layers]                # (B, 1)
        xw_scr = refs[6 + 3 * num_layers]                 # (S*B, 8H) scratch
        hseq_scr = refs[7 + 3 * num_layers]               # (S*B, 2H) scratch

        # Lane mask: True on forward-direction gate columns (even H-wide blocks).
        lane = lax.broadcasted_iota(jnp.int32, (B, H8), 1)
        fwd_lane = (lane % H2) < H

        layer_in = x_ref[...]                             # (S*B, in_dim)
        h_finals = []
        for l in range(num_layers):
            w_ih_ref, w_hh_ref, b_ref = layer_refs[l]

            # Hoisted out of the recurrence: weights, pre-broadcast bias, and the
            # input projection for all timesteps and both directions at once.
            w_hh = w_hh_ref[...]                          # (2H, 8H) block-diagonal
            bias = jnp.broadcast_to(b_ref[...], (B, H8))  # (B, 8H)
            xw_scr[...] = jnp.dot(layer_in, w_ih_ref[...],
                                  preferred_element_type=jnp.float32)

            h = jnp.zeros((B, H2), jnp.float32)           # [h_fwd | h_bwd]
            c = jnp.zeros((B, H2), jnp.float32)           # [c_fwd | c_bwd]
            for s in range(S):                            # fully unrolled (S static)
                t_f, t_b = s, S - 1 - s                   # fwd / bwd time index
                xg = jnp.where(fwd_lane,
                               xw_scr[t_f * B:(t_f + 1) * B, :],
                               xw_scr[t_b * B:(t_b + 1) * B, :])
                gates = xg + jnp.dot(h, w_hh,
                                     preferred_element_type=jnp.float32) + bias
                i = jax.nn.sigmoid(gates[:, 0:H2])            # [i_f | i_b]
                f = jax.nn.sigmoid(gates[:, H2:2 * H2])       # [f_f | f_b]
                g = jnp.tanh(gates[:, 2 * H2:3 * H2])         # [g_f | g_b]
                o = jax.nn.sigmoid(gates[:, 3 * H2:4 * H2])   # [o_f | o_b]
                c = f * c + i * g
                h = o * jnp.tanh(c)
                if l + 1 < num_layers:                    # only needed as next layer input
                    hseq_scr[t_f * B:(t_f + 1) * B, 0:H] = h[:, 0:H]
                    hseq_scr[t_b * B:(t_b + 1) * B, H:H2] = h[:, H:H2]
            h_finals.append(h)                            # == [h_n fwd | h_n bwd] of layer l
            if l + 1 < num_layers:
                layer_in = hseq_scr[...]                  # (S*B, 2H)

        # ---- FC head, fused (dropout = identity in eval mode) ----
        # PyTorch h_n concat order: [l0_fwd, l0_bwd, l1_fwd, l1_bwd]
        concat_h = jnp.concatenate(h_finals, axis=-1)     # (B, 2*H*num_layers)
        hid = jnp.dot(concat_h, fc1_w_ref[...],
                      preferred_element_type=jnp.float32) + fc1_b_ref[...]
        out_ref[...] = jnp.dot(hid, fc2_w_ref[...],
                               preferred_element_type=jnp.float32) + fc2_b_ref[...]

    return kernel


def _vmem():
    return pl.BlockSpec(memory_space=pltpu.MemorySpace.VMEM)


@jax.jit
def bilstm_2fc_forward(packed, sents, length):
    """Forward pass matching BiLSTM_2FC.forward (eval mode).

    `length` is unused, exactly as in the reference forward (no packing)."""
    del length

    emb_tbl = packed["embedding"]                 # (V, E)
    B, S = sents.shape
    H = packed["fc2_w"].shape[0]
    num_layers = len(packed["lstm"])

    # Time-major embedding gather, flattened to (S*B, E); row index = t*B + b.
    # (Gather itself stays in plain JAX; table row is used as-is, matching
    #  nn.Embedding.from_pretrained + post-hoc padding_idx.)
    idx = jnp.reshape(jnp.transpose(sents), (-1,))
    x2d = emb_tbl[idx]

    inputs = [x2d]
    for lyr in packed["lstm"]:
        inputs += [lyr["w_ih"], lyr["w_hh"], lyr["b"]]
    inputs += [packed["fc1_w"], packed["fc1_b"], packed["fc2_w"], packed["fc2_b"]]

    return pl.pallas_call(
        make_bilstm_kernel(num_layers, S, B, H),
        out_shape=jax.ShapeDtypeStruct((B, 1), jnp.float32),
        in_specs=[_vmem() for _ in inputs],
        out_specs=_vmem(),
        scratch_shapes=[pltpu.VMEM((S * B, 8 * H), jnp.float32),   # xw projection
                        pltpu.VMEM((S * B, 2 * H), jnp.float32)],  # layer output seq
    )(*inputs)


# ---------------------------------------------------------------------------
# Parameters: PyTorch-layout init + packing into the fused kernel layout
# ---------------------------------------------------------------------------
def init_pt_params(key, vocab, emb_dim, hidden, num_layers):
    """Random parameters in PyTorch nn.LSTM / nn.Linear layout."""
    ks = iter(jax.random.split(key, 64))

    def nrm(shape, scale=0.1):
        return (scale * jax.random.normal(next(ks), shape)).astype(jnp.float32)

    p = {"embedding": nrm((vocab, emb_dim))}
    layers = []
    in_dim = emb_dim
    for _ in range(num_layers):
        layer = {}
        for d in ("f", "b"):
            layer[f"weight_ih_{d}"] = nrm((4 * hidden, in_dim))
            layer[f"weight_hh_{d}"] = nrm((4 * hidden, hidden))
            layer[f"bias_ih_{d}"] = nrm((4 * hidden,))
            layer[f"bias_hh_{d}"] = nrm((4 * hidden,))
        layers.append(layer)
        in_dim = 2 * hidden
    p["lstm"] = layers
    p["fc1_w"] = nrm((hidden, hidden * num_layers * 2))
    p["fc1_b"] = nrm((hidden,))
    p["fc2_w"] = nrm((1, hidden))
    p["fc2_b"] = nrm((1,))
    return p


def pack_params(pt, hidden, num_layers):
    """One-time repack of PyTorch-layout params into the kernel layout."""
    H = hidden

    def interleave_cols(fwd, bwd):
        # (..., 4H) fwd/bwd with gate blocks [i,f,g,o] ->
        # (..., 8H) = [i_f, i_b, f_f, f_b, g_f, g_b, o_f, o_b]
        blocks = []
        for k in range(4):
            blocks.append(fwd[..., k * H:(k + 1) * H])
            blocks.append(bwd[..., k * H:(k + 1) * H])
        return jnp.concatenate(blocks, axis=-1)

    packed = {"embedding": pt["embedding"]}
    layers = []
    for l in range(num_layers):
        L = pt["lstm"][l]
        w_ih_f = L["weight_ih_f"].T          # (in, 4H)
        w_ih_b = L["weight_ih_b"].T
        w_hh_f = L["weight_hh_f"].T          # (H, 4H)
        w_hh_b = L["weight_hh_b"].T
        b_f = (L["bias_ih_f"] + L["bias_hh_f"])[None, :]
        b_b = (L["bias_ih_b"] + L["bias_hh_b"])[None, :]
        z = jnp.zeros_like(w_hh_f)
        layers.append({
            "w_ih": interleave_cols(w_ih_f, w_ih_b),                       # (in, 8H)
            "w_hh": jnp.concatenate([interleave_cols(w_hh_f, z),           # (2H, 8H)
                                     interleave_cols(z, w_hh_b)], axis=0),
            "b": interleave_cols(b_f, b_b),                                # (1, 8H)
        })
    packed["lstm"] = layers
    packed["fc1_w"] = pt["fc1_w"].T          # (2*H*num_layers, H)
    packed["fc1_b"] = pt["fc1_b"][None, :]   # (1, H)
    packed["fc2_w"] = pt["fc2_w"].T          # (H, 1)
    packed["fc2_b"] = pt["fc2_b"][None, :]   # (1, 1)
    return packed


# ---------------------------------------------------------------------------
# Pure-JAX reference (PyTorch semantics, eval mode) — used to verify the kernel
# ---------------------------------------------------------------------------
def reference_forward(pt, sents):
    H = pt["fc2_w"].shape[1]
    num_layers = len(pt["lstm"])
    emb = pt["embedding"][sents]             # (B, S, E)
    x = jnp.transpose(emb, (1, 0, 2))        # (S, B, E) time-major
    S, B, _ = x.shape

    layer_in = x
    h_finals = []
    for l in range(num_layers):
        L = pt["lstm"][l]
        dir_seqs = []
        for d, reverse in (("f", False), ("b", True)):
            W_ih, W_hh = L[f"weight_ih_{d}"], L[f"weight_hh_{d}"]
            bias = L[f"bias_ih_{d}"] + L[f"bias_hh_{d}"]
            seq = layer_in[::-1] if reverse else layer_in
            h = jnp.zeros((B, H), jnp.float32)
            c = jnp.zeros((B, H), jnp.float32)
            hs = []
            for t in range(S):
                gates = seq[t] @ W_ih.T + h @ W_hh.T + bias
                i = jax.nn.sigmoid(gates[:, 0:H])
                f = jax.nn.sigmoid(gates[:, H:2 * H])
                g = jnp.tanh(gates[:, 2 * H:3 * H])
                o = jax.nn.sigmoid(gates[:, 3 * H:4 * H])
                c = f * c + i * g
                h = o * jnp.tanh(c)
                hs.append(h)
            hs = jnp.stack(hs)
            if reverse:
                hs = hs[::-1]
            dir_seqs.append(hs)
            h_finals.append(h)
        layer_in = jnp.concatenate(dir_seqs, axis=-1)

    concat_h = jnp.concatenate(h_finals, axis=1)
    y = concat_h @ pt["fc1_w"].T + pt["fc1_b"]
    y = y @ pt["fc2_w"].T + pt["fc2_b"]
    return y


# ---------------------------------------------------------------------------
if __name__ == "__main__":
    VOCAB, EMB, HIDDEN, LAYERS = 20, 32, 32, 2
    BATCH, SEQ = 2, 8
    PADDING_IDX = 0  # attribute only in the reference module; no forward effect

    key = jax.random.PRNGKey(0)
    k_params, k_sents, k_len = jax.random.split(key, 3)

    pt_params = init_pt_params(k_params, VOCAB, EMB, HIDDEN, LAYERS)
    packed = pack_params(pt_params, HIDDEN, LAYERS)

    sents = jax.random.randint(k_sents, (BATCH, SEQ), 0, VOCAB, dtype=jnp.int32)
    length = jax.random.randint(k_len, (BATCH,), 1, SEQ + 1, dtype=jnp.int32)

    y = bilstm_2fc_forward(packed, sents, length)
    y = jax.block_until_ready(y)
    assert y.shape == (BATCH, 1) and y.dtype == jnp.float32

    # Correctness check against the pure-JAX reference (loose tolerance covers
    # MXU precision-mode differences between XLA and Mosaic matmuls).
    y_ref = reference_forward(pt_params, sents)
    max_err = float(jnp.max(jnp.abs(y - y_ref)))
    assert max_err < 2e-2, f"kernel/reference mismatch: max abs err = {max_err}"

    print("KERNEL_OK")
</pallas_src>

<mosaic_0001>
module attributes {stable_mosaic.version = 11 : i64} {
  func.func @kernel(%arg0: memref<16x32xf32, #tpu.memory_space<vmem>>, %arg1: memref<32x256xf32, #tpu.memory_space<vmem>>, %arg2: memref<64x256xf32, #tpu.memory_space<vmem>>, %arg3: memref<1x256xf32, #tpu.memory_space<vmem>>, %arg4: memref<64x256xf32, #tpu.memory_space<vmem>>, %arg5: memref<64x256xf32, #tpu.memory_space<vmem>>, %arg6: memref<1x256xf32, #tpu.memory_space<vmem>>, %arg7: memref<128x32xf32, #tpu.memory_space<vmem>>, %arg8: memref<1x32xf32, #tpu.memory_space<vmem>>, %arg9: memref<32x1xf32, #tpu.memory_space<vmem>>, %arg10: memref<1x1xf32, #tpu.memory_space<vmem>>, %arg11: memref<2x1xf32, #tpu.memory_space<vmem>>, %arg12: memref<16x256xf32, #tpu.memory_space<vmem>>, %arg13: memref<16x64xf32, #tpu.memory_space<vmem>>) attributes {dimension_semantics = [], scalar_prefetch = 0 : i64, scratch_operands = 2 : i64, tpu.core_type = #tpu.core_type<tc>} {
    %0 = tpu.iota {dimensions = array<i32: 1>} : vector<2x256xi32>
    %c64_i32 = arith.constant 64 : i32
    %c0_i32 = arith.constant 0 : i32
    %1 = arith.cmpi eq, %c64_i32, %c0_i32 : i32
    %c1_i32 = arith.constant 1 : i32
    %2 = arith.select %1, %c1_i32, %c64_i32 : i32
    %3 = vector.broadcast %2 : i32 to vector<2x256xi32>
    %4 = arith.remsi %0, %3 : vector<2x256xi32>
    %c0_i32_0 = arith.constant 0 : i32
    %5 = vector.broadcast %c0_i32_0 : i32 to vector<2x256xi32>
    %6 = arith.cmpi ne, %4, %5 : vector<2x256xi32>
    %c0_i32_1 = arith.constant 0 : i32
    %7 = vector.broadcast %c0_i32_1 : i32 to vector<2x256xi32>
    %8 = arith.cmpi slt, %4, %7 : vector<2x256xi32>
    %c0_i32_2 = arith.constant 0 : i32
    %9 = arith.cmpi slt, %2, %c0_i32_2 : i32
    %10 = vector.broadcast %9 : i1 to vector<2x256xi1>
    %11 = vector.broadcast %10 : vector<2x256xi1> to vector<2x256xi1>
    %12 = arith.xori %8, %11 : vector<2x256xi1>
    %13 = arith.andi %12, %6 : vector<2x256xi1>
    %14 = vector.broadcast %2 : i32 to vector<2x256xi32>
    %15 = arith.addi %4, %14 : vector<2x256xi32>
    %16 = arith.select %13, %15, %4 : vector<2x256xi1>, vector<2x256xi32>
    %c32_i32 = arith.constant 32 : i32
    %17 = vector.broadcast %c32_i32 : i32 to vector<2x256xi32>
    %18 = arith.cmpi slt, %16, %17 : vector<2x256xi32>
    %c0 = arith.constant 0 : index
    %c0_3 = arith.constant 0 : index
    %19 = vector.load %arg0[%c0, %c0_3] : memref<16x32xf32, #tpu.memory_space<vmem>>, vector<16x32xf32>
    %c0_4 = arith.constant 0 : index
    %c0_5 = arith.constant 0 : index
    %20 = vector.load %arg2[%c0_4, %c0_5] : memref<64x256xf32, #tpu.memory_space<vmem>>, vector<64x256xf32>
    %c0_6 = arith.constant 0 : index
    %c0_7 = arith.constant 0 : index
    %21 = vector.load %arg3[%c0_6, %c0_7] : memref<1x256xf32, #tpu.memory_space<vmem>>, vector<1x256xf32>
    %22 = vector.shape_cast %21 : vector<1x256xf32> to vector<1x256xf32>
    %23 = vector.broadcast %22 : vector<1x256xf32> to vector<2x256xf32>
    %c0_8 = arith.constant 0 : index
    %c0_9 = arith.constant 0 : index
    %24 = vector.load %arg1[%c0_8, %c0_9] : memref<32x256xf32, #tpu.memory_space<vmem>>, vector<32x256xf32>
    %cst = arith.constant dense<0.000000e+00> : vector<16x256xf32>
    %25 = tpu.matmul %19, %24, %cst {dimension_numbers = #tpu.dot_dimension_numbers<[1], [0], [0], [1], [0, 0, 1, 1], [], []>} : vector<16x32xf32>, vector<32x256xf32>, vector<16x256xf32> -> vector<16x256xf32>
    %c0_10 = arith.constant 0 : index
    %c0_11 = arith.constant 0 : index
    %26 = vector.load %arg12[%c0_10, %c0_11] : memref<16x256xf32, #tpu.memory_space<vmem>>, vector<16x256xf32>
    tpu.vector_store %arg12[%c0_10, %c0_11], %25 {strides = array<i32>} : memref<16x256xf32, #tpu.memory_space<vmem>>, vector<16x256xf32>,
    %cst_12 = arith.constant 0.000000e+00 : f32
    %27 = vector.broadcast %cst_12 : f32 to vector<2x64xf32>
    %cst_13 = arith.constant 0.000000e+00 : f32
    %28 = vector.broadcast %cst_13 : f32 to vector<2x64xf32>
    %c0_14 = arith.constant 0 : index
    %c0_15 = arith.constant 0 : index
    %29 = vector.load %arg12[%c0_14, %c0_15] : memref<16x256xf32, #tpu.memory_space<vmem>>, vector<2x256xf32>
    %c14 = arith.constant 14 : index
    %c0_16 = arith.constant 0 : index
    %30 = vector.load %arg12[%c14, %c0_16] : memref<16x256xf32, #tpu.memory_space<vmem>>, vector<2x256xf32>
    %31 = arith.select %18, %29, %30 : vector<2x256xi1>, vector<2x256xf32>
    %cst_17 = arith.constant dense<0.000000e+00> : vector<2x256xf32>
    %32 = tpu.matmul %27, %20, %cst_17 {dimension_numbers = #tpu.dot_dimension_numbers<[1], [0], [0], [1], [0, 0, 1, 1], [], []>} : vector<2x64xf32>, vector<64x256xf32>, vector<2x256xf32> -> vector<2x256xf32>
    %33 = arith.addf %31, %32 : vector<2x256xf32>
    %34 = arith.addf %33, %23 : vector<2x256xf32>
    %35 = vector.extract_strided_slice %34 {offsets = [0, 0], sizes = [2, 64], strides = [1, 1]} : vector<2x256xf32> to vector<2x64xf32>
    %36 = arith.negf %35 : vector<2x64xf32>
    %37 = math.exp %36 : vector<2x64xf32>
    %cst_18 = arith.constant 1.000000e+00 : f32
    %38 = vector.broadcast %cst_18 : f32 to vector<2x64xf32>
    %39 = arith.addf %38, %37 : vector<2x64xf32>
    %40 = arith.divf %38, %39 : vector<2x64xf32>
    %41 = vector.extract_strided_slice %34 {offsets = [0, 64], sizes = [2, 64], strides = [1, 1]} : vector<2x256xf32> to vector<2x64xf32>
    %42 = arith.negf %41 : vector<2x64xf32>
    %43 = math.exp %42 : vector<2x64xf32>
    %cst_19 = arith.constant 1.000000e+00 : f32
    %44 = vector.broadcast %cst_19 : f32 to vector<2x64xf32>
    %45 = arith.addf %44, %43 : vector<2x64xf32>
    %46 = arith.divf %44, %45 : vector<2x64xf32>
    %47 = vector.extract_strided_slice %34 {offsets = [0, 128], sizes = [2, 64], strides = [1, 1]} : vector<2x256xf32> to vector<2x64xf32>
    %48 = math.tanh %47 : vector<2x64xf32>
    %49 = vector.extract_strided_slice %34 {offsets = [0, 192], sizes = [2, 64], strides = [1, 1]} : vector<2x256xf32> to vector<2x64xf32>
    %50 = arith.negf %49 : vector<2x64xf32>
    %51 = math.exp %50 : vector<2x64xf32>
    %cst_20 = arith.constant 1.000000e+00 : f32
    %52 = vector.broadcast %cst_20 : f32 to vector<2x64xf32>
    %53 = arith.addf %52, %51 : vector<2x64xf32>
    %54 = arith.divf %52, %53 : vector<2x64xf32>
    %55 = arith.mulf %46, %28 : vector<2x64xf32>
    %56 = arith.mulf %40, %48 : vector<2x64xf32>
    %57 = arith.addf %55, %56 : vector<2x64xf32>
    %58 = math.tanh %57 : vector<2x64xf32>
    %59 = arith.mulf %54, %58 : vector<2x64xf32>
    %60 = vector.extract_strided_slice %59 {offsets = [0, 0], sizes = [2, 32], strides = [1, 1]} : vector<2x64xf32> to vector<2x32xf32>
    %c0_21 = arith.constant 0 : index
    %c0_22 = arith.constant 0 : index
    %61 = vector.load %arg13[%c0_21, %c0_22] : memref<16x64xf32, #tpu.memory_space<vmem>>, vector<2x32xf32>
    tpu.vector_store %arg13[%c0_21, %c0_22], %60 {strides = array<i32>} : memref<16x64xf32, #tpu.memory_space<vmem>>, vector<2x32xf32>,
    %62 = vector.extract_strided_slice %59 {offsets = [0, 32], sizes = [2, 32], strides = [1, 1]} : vector<2x64xf32> to vector<2x32xf32>
    %c14_23 = arith.constant 14 : index
    %c32 = arith.constant 32 : index
    %63 = vector.load %arg13[%c14_23, %c32] : memref<16x64xf32, #tpu.memory_space<vmem>>, vector<2x32xf32>
    tpu.vector_store %arg13[%c14_23, %c32], %62 {strides = array<i32>} : memref<16x64xf32, #tpu.memory_space<vmem>>, vector<2x32xf32>,
    %c2 = arith.constant 2 : index
    %c0_24 = arith.constant 0 : index
    %64 = vector.load %arg12[%c2, %c0_24] : memref<16x256xf32, #tpu.memory_space<vmem>>, vector<2x256xf32>
    %c12 = arith.constant 12 : index
    %c0_25 = arith.constant 0 : index
    %65 = vector.load %arg12[%c12, %c0_25] : memref<16x256xf32, #tpu.memory_space<vmem>>, vector<2x256xf32>
    %66 = arith.select %18, %64, %65 : vector<2x256xi1>, vector<2x256xf32>
    %cst_26 = arith.constant dense<0.000000e+00> : vector<2x256xf32>
    %67 = tpu.matmul %59, %20, %cst_26 {dimension_numbers = #tpu.dot_dimension_numbers<[1], [0], [0], [1], [0, 0, 1, 1], [], []>} : vector<2x64xf32>, vector<64x256xf32>, vector<2x256xf32> -> vector<2x256xf32>
    %68 = arith.addf %66, %67 : vector<2x256xf32>
    %69 = arith.addf %68, %23 : vector<2x256xf32>
    %70 = vector.extract_strided_slice %69 {offsets = [0, 0], sizes = [2, 64], strides = [1, 1]} : vector<2x256xf32> to vector<2x64xf32>
    %71 = arith.negf %70 : vector<2x64xf32>
    %72 = math.exp %71 : vector<2x64xf32>
    %cst_27 = arith.constant 1.000000e+00 : f32
    %73 = vector.broadcast %cst_27 : f32 to vector<2x64xf32>
    %74 = arith.addf %73, %72 : vector<2x64xf32>
    %75 = arith.divf %73, %74 : vector<2x64xf32>
    %76 = vector.extract_strided_slice %69 {offsets = [0, 64], sizes = [2, 64], strides = [1, 1]} : vector<2x256xf32> to vector<2x64xf32>
    %77 = arith.negf %76 : vector<2x64xf32>
    %78 = math.exp %77 : vector<2x64xf32>
    %cst_28 = arith.constant 1.000000e+00 : f32
    %79 = vector.broadcast %cst_28 : f32 to vector<2x64xf32>
    %80 = arith.addf %79, %78 : vector<2x64xf32>
    %81 = arith.divf %79, %80 : vector<2x64xf32>
    %82 = vector.extract_strided_slice %69 {offsets = [0, 128], sizes = [2, 64], strides = [1, 1]} : vector<2x256xf32> to vector<2x64xf32>
    %83 = math.tanh %82 : vector<2x64xf32>
    %84 = vector.extract_strided_slice %69 {offsets = [0, 192], sizes = [2, 64], strides = [1, 1]} : vector<2x256xf32> to vector<2x64xf32>
    %85 = arith.negf %84 : vector<2x64xf32>
    %86 = math.exp %85 : vector<2x64xf32>
    %cst_29 = arith.constant 1.000000e+00 : f32
    %87 = vector.broadcast %cst_29 : f32 to vector<2x64xf32>
    %88 = arith.addf %87, %86 : vector<2x64xf32>
    %89 = arith.divf %87, %88 : vector<2x64xf32>
    %90 = arith.mulf %81, %57 : vector<2x64xf32>
    %91 = arith.mulf %75, %83 : vector<2x64xf32>
    %92 = arith.addf %90, %91 : vector<2x64xf32>
    %93 = math.tanh %92 : vector<2x64xf32>
    %94 = arith.mulf %89, %93 : vector<2x64xf32>
    %95 = vector.extract_strided_slice %94 {offsets = [0, 0], sizes = [2, 32], strides = [1, 1]} : vector<2x64xf32> to vector<2x32xf32>
    %c2_30 = arith.constant 2 : index
    %c0_31 = arith.constant 0 : index
    %96 = vector.load %arg13[%c2_30, %c0_31] : memref<16x64xf32, #tpu.memory_space<vmem>>, vector<2x32xf32>
    tpu.vector_store %arg13[%c2_30, %c0_31], %95 {strides = array<i32>} : memref<16x64xf32, #tpu.memory_space<vmem>>, vector<2x32xf32>,
    %97 = vector.extract_strided_slice %94 {offsets = [0, 32], sizes = [2, 32], strides = [1, 1]} : vector<2x64xf32> to vector<2x32xf32>
    %c12_32 = arith.constant 12 : index
    %c32_33 = arith.constant 32 : index
    %98 = vector.load %arg13[%c12_32, %c32_33] : memref<16x64xf32, #tpu.memory_space<vmem>>, vector<2x32xf32>
    tpu.vector_store %arg13[%c12_32, %c32_33], %97 {strides = array<i32>} : memref<16x64xf32, #tpu.memory_space<vmem>>, vector<2x32xf32>,
    %c4 = arith.constant 4 : index
    %c0_34 = arith.constant 0 : index
    %99 = vector.load %arg12[%c4, %c0_34] : memref<16x256xf32, #tpu.memory_space<vmem>>, vector<2x256xf32>
    %c10 = arith.constant 10 : index
    %c0_35 = arith.constant 0 : index
    %100 = vector.load %arg12[%c10, %c0_35] : memref<16x256xf32, #tpu.memory_space<vmem>>, vector<2x256xf32>
    %101 = arith.select %18, %99, %100 : vector<2x256xi1>, vector<2x256xf32>
    %cst_36 = arith.constant dense<0.000000e+00> : vector<2x256xf32>
    %102 = tpu.matmul %94, %20, %cst_36 {dimension_numbers = #tpu.dot_dimension_numbers<[1], [0], [0], [1], [0, 0, 1, 1], [], []>} : vector<2x64xf32>, vector<64x256xf32>, vector<2x256xf32> -> vector<2x256xf32>
    %103 = arith.addf %101, %102 : vector<2x256xf32>
    %104 = arith.addf %103, %23 : vector<2x256xf32>
    %105 = vector.extract_strided_slice %104 {offsets = [0, 0], sizes = [2, 64], strides = [1, 1]} : vector<2x256xf32> to vector<2x64xf32>
    %106 = arith.negf %105 : vector<2x64xf32>
    %107 = math.exp %106 : vector<2x64xf32>
    %cst_37 = arith.constant 1.000000e+00 : f32
    %108 = vector.broadcast %cst_37 : f32 to vector<2x64xf32>
    %109 = arith.addf %108, %107 : vector<2x64xf32>
    %110 = arith.divf %108, %109 : vector<2x64xf32>
    %111 = vector.extract_strided_slice %104 {offsets = [0, 64], sizes = [2, 64], strides = [1, 1]} : vector<2x256xf32> to vector<2x64xf32>
    %112 = arith.negf %111 : vector<2x64xf32>
    %113 = math.exp %112 : vector<2x64xf32>
    %cst_38 = arith.constant 1.000000e+00 : f32
    %114 = vector.broadcast %cst_38 : f32 to vector<2x64xf32>
    %115 = arith.addf %114, %113 : vector<2x64xf32>
    %116 = arith.divf %114, %115 : vector<2x64xf32>
    %117 = vector.extract_strided_slice %104 {offsets = [0, 128], sizes = [2, 64], strides = [1, 1]} : vector<2x256xf32> to vector<2x64xf32>
    %118 = math.tanh %117 : vector<2x64xf32>
    %119 = vector.extract_strided_slice %104 {offsets = [0, 192], sizes = [2, 64], strides = [1, 1]} : vector<2x256xf32> to vector<2x64xf32>
    %120 = arith.negf %119 : vector<2x64xf32>
    %121 = math.exp %120 : vector<2x64xf32>
    %cst_39 = arith.constant 1.000000e+00 : f32
    %122 = vector.broadcast %cst_39 : f32 to vector<2x64xf32>
    %123 = arith.addf %122, %121 : vector<2x64xf32>
    %124 = arith.divf %122, %123 : vector<2x64xf32>
    %125 = arith.mulf %116, %92 : vector<2x64xf32>
    %126 = arith.mulf %110, %118 : vector<2x64xf32>
    %127 = arith.addf %125, %126 : vector<2x64xf32>
    %128 = math.tanh %127 : vector<2x64xf32>
    %129 = arith.mulf %124, %128 : vector<2x64xf32>
    %130 = vector.extract_strided_slice %129 {offsets = [0, 0], sizes = [2, 32], strides = [1, 1]} : vector<2x64xf32> to vector<2x32xf32>
    %c4_40 = arith.constant 4 : index
    %c0_41 = arith.constant 0 : index
    %131 = vector.load %arg13[%c4_40, %c0_41] : memref<16x64xf32, #tpu.memory_space<vmem>>, vector<2x32xf32>
    tpu.vector_store %arg13[%c4_40, %c0_41], %130 {strides = array<i32>} : memref<16x64xf32, #tpu.memory_space<vmem>>, vector<2x32xf32>,
    %132 = vector.extract_strided_slice %129 {offsets = [0, 32], sizes = [2, 32], strides = [1, 1]} : vector<2x64xf32> to vector<2x32xf32>
    %c10_42 = arith.constant 10 : index
    %c32_43 = arith.constant 32 : index
    %133 = vector.load %arg13[%c10_42, %c32_43] : memref<16x64xf32, #tpu.memory_space<vmem>>, vector<2x32xf32>
    tpu.vector_store %arg13[%c10_42, %c32_43], %132 {strides = array<i32>} : memref<16x64xf32, #tpu.memory_space<vmem>>, vector<2x32xf32>,
    %c6 = arith.constant 6 : index
    %c0_44 = arith.constant 0 : index
    %134 = vector.load %arg12[%c6, %c0_44] : memref<16x256xf32, #tpu.memory_space<vmem>>, vector<2x256xf32>
    %c8 = arith.constant 8 : index
    %c0_45 = arith.constant 0 : index
    %135 = vector.load %arg12[%c8, %c0_45] : memref<16x256xf32, #tpu.memory_space<vmem>>, vector<2x256xf32>
    %136 = arith.select %18, %134, %135 : vector<2x256xi1>, vector<2x256xf32>
    %cst_46 = arith.constant dense<0.000000e+00> : vector<2x256xf32>
    %137 = tpu.matmul %129, %20, %cst_46 {dimension_numbers = #tpu.dot_dimension_numbers<[1], [0], [0], [1], [0, 0, 1, 1], [], []>} : vector<2x64xf32>, vector<64x256xf32>, vector<2x256xf32> -> vector<2x256xf32>
    %138 = arith.addf %136, %137 : vector<2x256xf32>
    %139 = arith.addf %138, %23 : vector<2x256xf32>
    %140 = vector.extract_strided_slice %139 {offsets = [0, 0], sizes = [2, 64], strides = [1, 1]} : vector<2x256xf32> to vector<2x64xf32>
    %141 = arith.negf %140 : vector<2x64xf32>
    %142 = math.exp %141 : vector<2x64xf32>
    %cst_47 = arith.constant 1.000000e+00 : f32
    %143 = vector.broadcast %cst_47 : f32 to vector<2x64xf32>
    %144 = arith.addf %143, %142 : vector<2x64xf32>
    %145 = arith.divf %143, %144 : vector<2x64xf32>
    %146 = vector.extract_strided_slice %139 {offsets = [0, 64], sizes = [2, 64], strides = [1, 1]} : vector<2x256xf32> to vector<2x64xf32>
    %147 = arith.negf %146 : vector<2x64xf32>
    %148 = math.exp %147 : vector<2x64xf32>
    %cst_48 = arith.constant 1.000000e+00 : f32
    %149 = vector.broadcast %cst_48 : f32 to vector<2x64xf32>
    %150 = arith.addf %149, %148 : vector<2x64xf32>
    %151 = arith.divf %149, %150 : vector<2x64xf32>
    %152 = vector.extract_strided_slice %139 {offsets = [0, 128], sizes = [2, 64], strides = [1, 1]} : vector<2x256xf32> to vector<2x64xf32>
    %153 = math.tanh %152 : vector<2x64xf32>
    %154 = vector.extract_strided_slice %139 {offsets = [0, 192], sizes = [2, 64], strides = [1, 1]} : vector<2x256xf32> to vector<2x64xf32>
    %155 = arith.negf %154 : vector<2x64xf32>
    %156 = math.exp %155 : vector<2x64xf32>
    %cst_49 = arith.constant 1.000000e+00 : f32
    %157 = vector.broadcast %cst_49 : f32 to vector<2x64xf32>
    %158 = arith.addf %157, %156 : vector<2x64xf32>
    %159 = arith.divf %157, %158 : vector<2x64xf32>
    %160 = arith.mulf %151, %127 : vector<2x64xf32>
    %161 = arith.mulf %145, %153 : vector<2x64xf32>
    %162 = arith.addf %160, %161 : vector<2x64xf32>
    %163 = math.tanh %162 : vector<2x64xf32>
    %164 = arith.mulf %159, %163 : vector<2x64xf32>
    %165 = vector.extract_strided_slice %164 {offsets = [0, 0], sizes = [2, 32], strides = [1, 1]} : vector<2x64xf32> to vector<2x32xf32>
    %c6_50 = arith.constant 6 : index
    %c0_51 = arith.constant 0 : index
    %166 = vector.load %arg13[%c6_50, %c0_51] : memref<16x64xf32, #tpu.memory_space<vmem>>, vector<2x32xf32>
    tpu.vector_store %arg13[%c6_50, %c0_51], %165 {strides = array<i32>} : memref<16x64xf32, #tpu.memory_space<vmem>>, vector<2x32xf32>,
    %167 = vector.extract_strided_slice %164 {offsets = [0, 32], sizes = [2, 32], strides = [1, 1]} : vector<2x64xf32> to vector<2x32xf32>
    %c8_52 = arith.constant 8 : index
    %c32_53 = arith.constant 32 : index
    %168 = vector.load %arg13[%c8_52, %c32_53] : memref<16x64xf32, #tpu.memory_space<vmem>>, vector<2x32xf32>
    tpu.vector_store %arg13[%c8_52, %c32_53], %167 {strides = array<i32>} : memref<16x64xf32, #tpu.memory_space<vmem>>, vector<2x32xf32>,
    %c8_54 = arith.constant 8 : index
    %c0_55 = arith.constant 0 : index
    %169 = vector.load %arg12[%c8_54, %c0_55] : memref<16x256xf32, #tpu.memory_space<vmem>>, vector<2x256xf32>
    %c6_56 = arith.constant 6 : index
    %c0_57 = arith.constant 0 : index
    %170 = vector.load %arg12[%c6_56, %c0_57] : memref<16x256xf32, #tpu.memory_space<vmem>>, vector<2x256xf32>
    %171 = arith.select %18, %169, %170 : vector<2x256xi1>, vector<2x256xf32>
    %cst_58 = arith.constant dense<0.000000e+00> : vector<2x256xf32>
    %172 = tpu.matmul %164, %20, %cst_58 {dimension_numbers = #tpu.dot_dimension_numbers<[1], [0], [0], [1], [0, 0, 1, 1], [], []>} : vector<2x64xf32>, vector<64x256xf32>, vector<2x256xf32> -> vector<2x256xf32>
    %173 = arith.addf %171, %172 : vector<2x256xf32>
    %174 = arith.addf %173, %23 : vector<2x256xf32>
    %175 = vector.extract_strided_slice %174 {offsets = [0, 0], sizes = [2, 64], strides = [1, 1]} : vector<2x256xf32> to vector<2x64xf32>
    %176 = arith.negf %175 : vector<2x64xf32>
    %177 = math.exp %176 : vector<2x64xf32>
    %cst_59 = arith.constant 1.000000e+00 : f32
    %178 = vector.broadcast %cst_59 : f32 to vector<2x64xf32>
    %179 = arith.addf %178, %177 : vector<2x64xf32>
    %180 = arith.divf %178, %179 : vector<2x64xf32>
    %181 = vector.extract_strided_slice %174 {offsets = [0, 64], sizes = [2, 64], strides = [1, 1]} : vector<2x256xf32> to vector<2x64xf32>
    %182 = arith.negf %181 : vector<2x64xf32>
    %183 = math.exp %182 : vector<2x64xf32>
    %cst_60 = arith.constant 1.000000e+00 : f32
    %184 = vector.broadcast %cst_60 : f32 to vector<2x64xf32>
    %185 = arith.addf %184, %183 : vector<2x64xf32>
    %186 = arith.divf %184, %185 : vector<2x64xf32>
    %187 = vector.extract_strided_slice %174 {offsets = [0, 128], sizes = [2, 64], strides = [1, 1]} : vector<2x256xf32> to vector<2x64xf32>
    %188 = math.tanh %187 : vector<2x64xf32>
    %189 = vector.extract_strided_slice %174 {offsets = [0, 192], sizes = [2, 64], strides = [1, 1]} : vector<2x256xf32> to vector<2x64xf32>
    %190 = arith.negf %189 : vector<2x64xf32>
    %191 = math.exp %190 : vector<2x64xf32>
    %cst_61 = arith.constant 1.000000e+00 : f32
    %192 = vector.broadcast %cst_61 : f32 to vector<2x64xf32>
    %193 = arith.addf %192, %191 : vector<2x64xf32>
    %194 = arith.divf %192, %193 : vector<2x64xf32>
    %195 = arith.mulf %186, %162 : vector<2x64xf32>
    %196 = arith.mulf %180, %188 : vector<2x64xf32>
    %197 = arith.addf %195, %196 : vector<2x64xf32>
    %198 = math.tanh %197 : vector<2x64xf32>
    %199 = arith.mulf %194, %198 : vector<2x64xf32>
    %200 = vector.extract_strided_slice %199 {offsets = [0, 0], sizes = [2, 32], strides = [1, 1]} : vector<2x64xf32> to vector<2x32xf32>
    %c8_62 = arith.constant 8 : index
    %c0_63 = arith.constant 0 : index
    %201 = vector.load %arg13[%c8_62, %c0_63] : memref<16x64xf32, #tpu.memory_space<vmem>>, vector<2x32xf32>
    tpu.vector_store %arg13[%c8_62, %c0_63], %200 {strides = array<i32>} : memref<16x64xf32, #tpu.memory_space<vmem>>, vector<2x32xf32>,
    %202 = vector.extract_strided_slice %199 {offsets = [0, 32], sizes = [2, 32], strides = [1, 1]} : vector<2x64xf32> to vector<2x32xf32>
    %c6_64 = arith.constant 6 : index
    %c32_65 = arith.constant 32 : index
    %203 = vector.load %arg13[%c6_64, %c32_65] : memref<16x64xf32, #tpu.memory_space<vmem>>, vector<2x32xf32>
    tpu.vector_store %arg13[%c6_64, %c32_65], %202 {strides = array<i32>} : memref<16x64xf32, #tpu.memory_space<vmem>>, vector<2x32xf32>,
    %c10_66 = arith.constant 10 : index
    %c0_67 = arith.constant 0 : index
    %204 = vector.load %arg12[%c10_66, %c0_67] : memref<16x256xf32, #tpu.memory_space<vmem>>, vector<2x256xf32>
    %c4_68 = arith.constant 4 : index
    %c0_69 = arith.constant 0 : index
    %205 = vector.load %arg12[%c4_68, %c0_69] : memref<16x256xf32, #tpu.memory_space<vmem>>, vector<2x256xf32>
    %206 = arith.select %18, %204, %205 : vector<2x256xi1>, vector<2x256xf32>
    %cst_70 = arith.constant dense<0.000000e+00> : vector<2x256xf32>
    %207 = tpu.matmul %199, %20, %cst_70 {dimension_numbers = #tpu.dot_dimension_numbers<[1], [0], [0], [1], [0, 0, 1, 1], [], []>} : vector<2x64xf32>, vector<64x256xf32>, vector<2x256xf32> -> vector<2x256xf32>
    %208 = arith.addf %206, %207 : vector<2x256xf32>
    %209 = arith.addf %208, %23 : vector<2x256xf32>
    %210 = vector.extract_strided_slice %209 {offsets = [0, 0], sizes = [2, 64], strides = [1, 1]} : vector<2x256xf32> to vector<2x64xf32>
    %211 = arith.negf %210 : vector<2x64xf32>
    %212 = math.exp %211 : vector<2x64xf32>
    %cst_71 = arith.constant 1.000000e+00 : f32
    %213 = vector.broadcast %cst_71 : f32 to vector<2x64xf32>
    %214 = arith.addf %213, %212 : vector<2x64xf32>
    %215 = arith.divf %213, %214 : vector<2x64xf32>
    %216 = vector.extract_strided_slice %209 {offsets = [0, 64], sizes = [2, 64], strides = [1, 1]} : vector<2x256xf32> to vector<2x64xf32>
    %217 = arith.negf %216 : vector<2x64xf32>
    %218 = math.exp %217 : vector<2x64xf32>
    %cst_72 = arith.constant 1.000000e+00 : f32
    %219 = vector.broadcast %cst_72 : f32 to vector<2x64xf32>
    %220 = arith.addf %219, %218 : vector<2x64xf32>
    %221 = arith.divf %219, %220 : vector<2x64xf32>
    %222 = vector.extract_strided_slice %209 {offsets = [0, 128], sizes = [2, 64], strides = [1, 1]} : vector<2x256xf32> to vector<2x64xf32>
    %223 = math.tanh %222 : vector<2x64xf32>
    %224 = vector.extract_strided_slice %209 {offsets = [0, 192], sizes = [2, 64], strides = [1, 1]} : vector<2x256xf32> to vector<2x64xf32>
    %225 = arith.negf %224 : vector<2x64xf32>
    %226 = math.exp %225 : vector<2x64xf32>
    %cst_73 = arith.constant 1.000000e+00 : f32
    %227 = vector.broadcast %cst_73 : f32 to vector<2x64xf32>
    %228 = arith.addf %227, %226 : vector<2x64xf32>
    %229 = arith.divf %227, %228 : vector<2x64xf32>
    %230 = arith.mulf %221, %197 : vector<2x64xf32>
    %231 = arith.mulf %215, %223 : vector<2x64xf32>
    %232 = arith.addf %230, %231 : vector<2x64xf32>
    %233 = math.tanh %232 : vector<2x64xf32>
    %234 = arith.mulf %229, %233 : vector<2x64xf32>
    %235 = vector.extract_strided_slice %234 {offsets = [0, 0], sizes = [2, 32], strides = [1, 1]} : vector<2x64xf32> to vector<2x32xf32>
    %c10_74 = arith.constant 10 : index
    %c0_75 = arith.constant 0 : index
    %236 = vector.load %arg13[%c10_74, %c0_75] : memref<16x64xf32, #tpu.memory_space<vmem>>, vector<2x32xf32>
    tpu.vector_store %arg13[%c10_74, %c0_75], %235 {strides = array<i32>} : memref<16x64xf32, #tpu.memory_space<vmem>>, vector<2x32xf32>,
    %237 = vector.extract_strided_slice %234 {offsets = [0, 32], sizes = [2, 32], strides = [1, 1]} : vector<2x64xf32> to vector<2x32xf32>
    %c4_76 = arith.constant 4 : index
    %c32_77 = arith.constant 32 : index
    %238 = vector.load %arg13[%c4_76, %c32_77] : memref<16x64xf32, #tpu.memory_space<vmem>>, vector<2x32xf32>
    tpu.vector_store %arg13[%c4_76, %c32_77], %237 {strides = array<i32>} : memref<16x64xf32, #tpu.memory_space<vmem>>, vector<2x32xf32>,
    %c12_78 = arith.constant 12 : index
    %c0_79 = arith.constant 0 : index
    %239 = vector.load %arg12[%c12_78, %c0_79] : memref<16x256xf32, #tpu.memory_space<vmem>>, vector<2x256xf32>
    %c2_80 = arith.constant 2 : index
    %c0_81 = arith.constant 0 : index
    %240 = vector.load %arg12[%c2_80, %c0_81] : memref<16x256xf32, #tpu.memory_space<vmem>>, vector<2x256xf32>
    %241 = arith.select %18, %239, %240 : vector<2x256xi1>, vector<2x256xf32>
    %cst_82 = arith.constant dense<0.000000e+00> : vector<2x256xf32>
    %242 = tpu.matmul %234, %20, %cst_82 {dimension_numbers = #tpu.dot_dimension_numbers<[1], [0], [0], [1], [0, 0, 1, 1], [], []>} : vector<2x64xf32>, vector<64x256xf32>, vector<2x256xf32> -> vector<2x256xf32>
    %243 = arith.addf %241, %242 : vector<2x256xf32>
    %244 = arith.addf %243, %23 : vector<2x256xf32>
    %245 = vector.extract_strided_slice %244 {offsets = [0, 0], sizes = [2, 64], strides = [1, 1]} : vector<2x256xf32> to vector<2x64xf32>
    %246 = arith.negf %245 : vector<2x64xf32>
    %247 = math.exp %246 : vector<2x64xf32>
    %cst_83 = arith.constant 1.000000e+00 : f32
    %248 = vector.broadcast %cst_83 : f32 to vector<2x64xf32>
    %249 = arith.addf %248, %247 : vector<2x64xf32>
    %250 = arith.divf %248, %249 : vector<2x64xf32>
    %251 = vector.extract_strided_slice %244 {offsets = [0, 64], sizes = [2, 64], strides = [1, 1]} : vector<2x256xf32> to vector<2x64xf32>
    %252 = arith.negf %251 : vector<2x64xf32>
    %253 = math.exp %252 : vector<2x64xf32>
    %cst_84 = arith.constant 1.000000e+00 : f32
    %254 = vector.broadcast %cst_84 : f32 to vector<2x64xf32>
    %255 = arith.addf %254, %253 : vector<2x64xf32>
    %256 = arith.divf %254, %255 : vector<2x64xf32>
    %257 = vector.extract_strided_slice %244 {offsets = [0, 128], sizes = [2, 64], strides = [1, 1]} : vector<2x256xf32> to vector<2x64xf32>
    %258 = math.tanh %257 : vector<2x64xf32>
    %259 = vector.extract_strided_slice %244 {offsets = [0, 192], sizes = [2, 64], strides = [1, 1]} : vector<2x256xf32> to vector<2x64xf32>
    %260 = arith.negf %259 : vector<2x64xf32>
    %261 = math.exp %260 : vector<2x64xf32>
    %cst_85 = arith.constant 1.000000e+00 : f32
    %262 = vector.broadcast %cst_85 : f32 to vector<2x64xf32>
    %263 = arith.addf %262, %261 : vector<2x64xf32>
    %264 = arith.divf %262, %263 : vector<2x64xf32>
    %265 = arith.mulf %256, %232 : vector<2x64xf32>
    %266 = arith.mulf %250, %258 : vector<2x64xf32>
    %267 = arith.addf %265, %266 : vector<2x64xf32>
    %268 = math.tanh %267 : vector<2x64xf32>
    %269 = arith.mulf %264, %268 : vector<2x64xf32>
    %270 = vector.extract_strided_slice %269 {offsets = [0, 0], sizes = [2, 32], strides = [1, 1]} : vector<2x64xf32> to vector<2x32xf32>
    %c12_86 = arith.constant 12 : index
    %c0_87 = arith.constant 0 : index
    %271 = vector.load %arg13[%c12_86, %c0_87] : memref<16x64xf32, #tpu.memory_space<vmem>>, vector<2x32xf32>
    tpu.vector_store %arg13[%c12_86, %c0_87], %270 {strides = array<i32>} : memref<16x64xf32, #tpu.memory_space<vmem>>, vector<2x32xf32>,
    %272 = vector.extract_strided_slice %269 {offsets = [0, 32], sizes = [2, 32], strides = [1, 1]} : vector<2x64xf32> to vector<2x32xf32>
    %c2_88 = arith.constant 2 : index
    %c32_89 = arith.constant 32 : index
    %273 = vector.load %arg13[%c2_88, %c32_89] : memref<16x64xf32, #tpu.memory_space<vmem>>, vector<2x32xf32>
    tpu.vector_store %arg13[%c2_88, %c32_89], %272 {strides = array<i32>} : memref<16x64xf32, #tpu.memory_space<vmem>>, vector<2x32xf32>,
    %c14_90 = arith.constant 14 : index
    %c0_91 = arith.constant 0 : index
    %274 = vector.load %arg12[%c14_90, %c0_91] : memref<16x256xf32, #tpu.memory_space<vmem>>, vector<2x256xf32>
    %c0_92 = arith.constant 0 : index
    %c0_93 = arith.constant 0 : index
    %275 = vector.load %arg12[%c0_92, %c0_93] : memref<16x256xf32, #tpu.memory_space<vmem>>, vector<2x256xf32>
    %276 = arith.select %18, %274, %275 : vector<2x256xi1>, vector<2x256xf32>
    %cst_94 = arith.constant dense<0.000000e+00> : vector<2x256xf32>
    %277 = tpu.matmul %269, %20, %cst_94 {dimension_numbers = #tpu.dot_dimension_numbers<[1], [0], [0], [1], [0, 0, 1, 1], [], []>} : vector<2x64xf32>, vector<64x256xf32>, vector<2x256xf32> -> vector<2x256xf32>
    %278 = arith.addf %276, %277 : vector<2x256xf32>
    %279 = arith.addf %278, %23 : vector<2x256xf32>
    %280 = vector.extract_strided_slice %279 {offsets = [0, 0], sizes = [2, 64], strides = [1, 1]} : vector<2x256xf32> to vector<2x64xf32>
    %281 = arith.negf %280 : vector<2x64xf32>
    %282 = math.exp %281 : vector<2x64xf32>
    %cst_95 = arith.constant 1.000000e+00 : f32
    %283 = vector.broadcast %cst_95 : f32 to vector<2x64xf32>
    %284 = arith.addf %283, %282 : vector<2x64xf32>
    %285 = arith.divf %283, %284 : vector<2x64xf32>
    %286 = vector.extract_strided_slice %279 {offsets = [0, 64], sizes = [2, 64], strides = [1, 1]} : vector<2x256xf32> to vector<2x64xf32>
    %287 = arith.negf %286 : vector<2x64xf32>
    %288 = math.exp %287 : vector<2x64xf32>
    %cst_96 = arith.constant 1.000000e+00 : f32
    %289 = vector.broadcast %cst_96 : f32 to vector<2x64xf32>
    %290 = arith.addf %289, %288 : vector<2x64xf32>
    %291 = arith.divf %289, %290 : vector<2x64xf32>
    %292 = vector.extract_strided_slice %279 {offsets = [0, 128], sizes = [2, 64], strides = [1, 1]} : vector<2x256xf32> to vector<2x64xf32>
    %293 = math.tanh %292 : vector<2x64xf32>
    %294 = vector.extract_strided_slice %279 {offsets = [0, 192], sizes = [2, 64], strides = [1, 1]} : vector<2x256xf32> to vector<2x64xf32>
    %295 = arith.negf %294 : vector<2x64xf32>
    %296 = math.exp %295 : vector<2x64xf32>
    %cst_97 = arith.constant 1.000000e+00 : f32
    %297 = vector.broadcast %cst_97 : f32 to vector<2x64xf32>
    %298 = arith.addf %297, %296 : vector<2x64xf32>
    %299 = arith.divf %297, %298 : vector<2x64xf32>
    %300 = arith.mulf %291, %267 : vector<2x64xf32>
    %301 = arith.mulf %285, %293 : vector<2x64xf32>
    %302 = arith.addf %300, %301 : vector<2x64xf32>
    %303 = math.tanh %302 : vector<2x64xf32>
    %304 = arith.mulf %299, %303 : vector<2x64xf32>
    %305 = vector.extract_strided_slice %304 {offsets = [0, 0], sizes = [2, 32], strides = [1, 1]} : vector<2x64xf32> to vector<2x32xf32>
    %c14_98 = arith.constant 14 : index
    %c0_99 = arith.constant 0 : index
    %306 = vector.load %arg13[%c14_98, %c0_99] : memref<16x64xf32, #tpu.memory_space<vmem>>, vector<2x32xf32>
    tpu.vector_store %arg13[%c14_98, %c0_99], %305 {strides = array<i32>} : memref<16x64xf32, #tpu.memory_space<vmem>>, vector<2x32xf32>,
    %307 = vector.extract_strided_slice %304 {offsets = [0, 32], sizes = [2, 32], strides = [1, 1]} : vector<2x64xf32> to vector<2x32xf32>
    %c0_100 = arith.constant 0 : index
    %c32_101 = arith.constant 32 : index
    %308 = vector.load %arg13[%c0_100, %c32_101] : memref<16x64xf32, #tpu.memory_space<vmem>>, vector<2x32xf32>
    tpu.vector_store %arg13[%c0_100, %c32_101], %307 {strides = array<i32>} : memref<16x64xf32, #tpu.memory_space<vmem>>, vector<2x32xf32>,
    %c0_102 = arith.constant 0 : index
    %c0_103 = arith.constant 0 : index
    %309 = vector.load %arg13[%c0_102, %c0_103] : memref<16x64xf32, #tpu.memory_space<vmem>>, vector<16x64xf32>
    %c0_104 = arith.constant 0 : index
    %c0_105 = arith.constant 0 : index
    %310 = vector.load %arg5[%c0_104, %c0_105] : memref<64x256xf32, #tpu.memory_space<vmem>>, vector<64x256xf32>
    %c0_106 = arith.constant 0 : index
    %c0_107 = arith.constant 0 : index
    %311 = vector.load %arg6[%c0_106, %c0_107] : memref<1x256xf32, #tpu.memory_space<vmem>>, vector<1x256xf32>
    %312 = vector.shape_cast %311 : vector<1x256xf32> to vector<1x256xf32>
    %313 = vector.broadcast %312 : vector<1x256xf32> to vector<2x256xf32>
    %c0_108 = arith.constant 0 : index
    %c0_109 = arith.constant 0 : index
    %314 = vector.load %arg4[%c0_108, %c0_109] : memref<64x256xf32, #tpu.memory_space<vmem>>, vector<64x256xf32>
    %cst_110 = arith.constant dense<0.000000e+00> : vector<16x256xf32>
    %315 = tpu.matmul %309, %314, %cst_110 {dimension_numbers = #tpu.dot_dimension_numbers<[1], [0], [0], [1], [0, 0, 1, 1], [], []>} : vector<16x64xf32>, vector<64x256xf32>, vector<16x256xf32> -> vector<16x256xf32>
    %c0_111 = arith.constant 0 : index
    %c0_112 = arith.constant 0 : index
    %316 = vector.load %arg12[%c0_111, %c0_112] : memref<16x256xf32, #tpu.memory_space<vmem>>, vector<16x256xf32>
    tpu.vector_store %arg12[%c0_111, %c0_112], %315 {strides = array<i32>} : memref<16x256xf32, #tpu.memory_space<vmem>>, vector<16x256xf32>,
    %cst_113 = arith.constant 0.000000e+00 : f32
    %317 = vector.broadcast %cst_113 : f32 to vector<2x64xf32>
    %cst_114 = arith.constant 0.000000e+00 : f32
    %318 = vector.broadcast %cst_114 : f32 to vector<2x64xf32>
    %c0_115 = arith.constant 0 : index
    %c0_116 = arith.constant 0 : index
    %319 = vector.load %arg12[%c0_115, %c0_116] : memref<16x256xf32, #tpu.memory_space<vmem>>, vector<2x256xf32>
    %c14_117 = arith.constant 14 : index
    %c0_118 = arith.constant 0 : index
    %320 = vector.load %arg12[%c14_117, %c0_118] : memref<16x256xf32, #tpu.memory_space<vmem>>, vector<2x256xf32>
    %321 = arith.select %18, %319, %320 : vector<2x256xi1>, vector<2x256xf32>
    %cst_119 = arith.constant dense<0.000000e+00> : vector<2x256xf32>
    %322 = tpu.matmul %317, %310, %cst_119 {dimension_numbers = #tpu.dot_dimension_numbers<[1], [0], [0], [1], [0, 0, 1, 1], [], []>} : vector<2x64xf32>, vector<64x256xf32>, vector<2x256xf32> -> vector<2x256xf32>
    %323 = arith.addf %321, %322 : vector<2x256xf32>
    %324 = arith.addf %323, %313 : vector<2x256xf32>
    %325 = vector.extract_strided_slice %324 {offsets = [0, 0], sizes = [2, 64], strides = [1, 1]} : vector<2x256xf32> to vector<2x64xf32>
    %326 = arith.negf %325 : vector<2x64xf32>
    %327 = math.exp %326 : vector<2x64xf32>
    %cst_120 = arith.constant 1.000000e+00 : f32
    %328 = vector.broadcast %cst_120 : f32 to vector<2x64xf32>
    %329 = arith.addf %328, %327 : vector<2x64xf32>
    %330 = arith.divf %328, %329 : vector<2x64xf32>
    %331 = vector.extract_strided_slice %324 {offsets = [0, 64], sizes = [2, 64], strides = [1, 1]} : vector<2x256xf32> to vector<2x64xf32>
    %332 = arith.negf %331 : vector<2x64xf32>
    %333 = math.exp %332 : vector<2x64xf32>
    %cst_121 = arith.constant 1.000000e+00 : f32
    %334 = vector.broadcast %cst_121 : f32 to vector<2x64xf32>
    %335 = arith.addf %334, %333 : vector<2x64xf32>
    %336 = arith.divf %334, %335 : vector<2x64xf32>
    %337 = vector.extract_strided_slice %324 {offsets = [0, 128], sizes = [2, 64], strides = [1, 1]} : vector<2x256xf32> to vector<2x64xf32>
    %338 = math.tanh %337 : vector<2x64xf32>
    %339 = vector.extract_strided_slice %324 {offsets = [0, 192], sizes = [2, 64], strides = [1, 1]} : vector<2x256xf32> to vector<2x64xf32>
    %340 = arith.negf %339 : vector<2x64xf32>
    %341 = math.exp %340 : vector<2x64xf32>
    %cst_122 = arith.constant 1.000000e+00 : f32
    %342 = vector.broadcast %cst_122 : f32 to vector<2x64xf32>
    %343 = arith.addf %342, %341 : vector<2x64xf32>
    %344 = arith.divf %342, %343 : vector<2x64xf32>
    %345 = arith.mulf %336, %318 : vector<2x64xf32>
    %346 = arith.mulf %330, %338 : vector<2x64xf32>
    %347 = arith.addf %345, %346 : vector<2x64xf32>
    %348 = math.tanh %347 : vector<2x64xf32>
    %349 = arith.mulf %344, %348 : vector<2x64xf32>
    %c2_123 = arith.constant 2 : index
    %c0_124 = arith.constant 0 : index
    %350 = vector.load %arg12[%c2_123, %c0_124] : memref<16x256xf32, #tpu.memory_space<vmem>>, vector<2x256xf32>
    %c12_125 = arith.constant 12 : index
    %c0_126 = arith.constant 0 : index
    %351 = vector.load %arg12[%c12_125, %c0_126] : memref<16x256xf32, #tpu.memory_space<vmem>>, vector<2x256xf32>
    %352 = arith.select %18, %350, %351 : vector<2x256xi1>, vector<2x256xf32>
    %cst_127 = arith.constant dense<0.000000e+00> : vector<2x256xf32>
    %353 = tpu.matmul %349, %310, %cst_127 {dimension_numbers = #tpu.dot_dimension_numbers<[1], [0], [0], [1], [0, 0, 1, 1], [], []>} : vector<2x64xf32>, vector<64x256xf32>, vector<2x256xf32> -> vector<2x256xf32>
    %354 = arith.addf %352, %353 : vector<2x256xf32>
    %355 = arith.addf %354, %313 : vector<2x256xf32>
    %356 = vector.extract_strided_slice %355 {offsets = [0, 0], sizes = [2, 64], strides = [1, 1]} : vector<2x256xf32> to vector<2x64xf32>
    %357 = arith.negf %356 : vector<2x64xf32>
    %358 = math.exp %357 : vector<2x64xf32>
    %cst_128 = arith.constant 1.000000e+00 : f32
    %359 = vector.broadcast %cst_128 : f32 to vector<2x64xf32>
    %360 = arith.addf %359, %358 : vector<2x64xf32>
    %361 = arith.divf %359, %360 : vector<2x64xf32>
    %362 = vector.extract_strided_slice %355 {offsets = [0, 64], sizes = [2, 64], strides = [1, 1]} : vector<2x256xf32> to vector<2x64xf32>
    %363 = arith.negf %362 : vector<2x64xf32>
    %364 = math.exp %363 : vector<2x64xf32>
    %cst_129 = arith.constant 1.000000e+00 : f32
    %365 = vector.broadcast %cst_129 : f32 to vector<2x64xf32>
    %366 = arith.addf %365, %364 : vector<2x64xf32>
    %367 = arith.divf %365, %366 : vector<2x64xf32>
    %368 = vector.extract_strided_slice %355 {offsets = [0, 128], sizes = [2, 64], strides = [1, 1]} : vector<2x256xf32> to vector<2x64xf32>
    %369 = math.tanh %368 : vector<2x64xf32>
    %370 = vector.extract_strided_slice %355 {offsets = [0, 192], sizes = [2, 64], strides = [1, 1]} : vector<2x256xf32> to vector<2x64xf32>
    %371 = arith.negf %370 : vector<2x64xf32>
    %372 = math.exp %371 : vector<2x64xf32>
    %cst_130 = arith.constant 1.000000e+00 : f32
    %373 = vector.broadcast %cst_130 : f32 to vector<2x64xf32>
    %374 = arith.addf %373, %372 : vector<2x64xf32>
    %375 = arith.divf %373, %374 : vector<2x64xf32>
    %376 = arith.mulf %367, %347 : vector<2x64xf32>
    %377 = arith.mulf %361, %369 : vector<2x64xf32>
    %378 = arith.addf %376, %377 : vector<2x64xf32>
    %379 = math.tanh %378 : vector<2x64xf32>
    %380 = arith.mulf %375, %379 : vector<2x64xf32>
    %c4_131 = arith.constant 4 : index
    %c0_132 = arith.constant 0 : index
    %381 = vector.load %arg12[%c4_131, %c0_132] : memref<16x256xf32, #tpu.memory_space<vmem>>, vector<2x256xf32>
    %c10_133 = arith.constant 10 : index
    %c0_134 = arith.constant 0 : index
    %382 = vector.load %arg12[%c10_133, %c0_134] : memref<16x256xf32, #tpu.memory_space<vmem>>, vector<2x256xf32>
    %383 = arith.select %18, %381, %382 : vector<2x256xi1>, vector<2x256xf32>
    %cst_135 = arith.constant dense<0.000000e+00> : vector<2x256xf32>
    %384 = tpu.matmul %380, %310, %cst_135 {dimension_numbers = #tpu.dot_dimension_numbers<[1], [0], [0], [1], [0, 0, 1, 1], [], []>} : vector<2x64xf32>, vector<64x256xf32>, vector<2x256xf32> -> vector<2x256xf32>
    %385 = arith.addf %383, %384 : vector<2x256xf32>
    %386 = arith.addf %385, %313 : vector<2x256xf32>
    %387 = vector.extract_strided_slice %386 {offsets = [0, 0], sizes = [2, 64], strides = [1, 1]} : vector<2x256xf32> to vector<2x64xf32>
    %388 = arith.negf %387 : vector<2x64xf32>
    %389 = math.exp %388 : vector<2x64xf32>
    %cst_136 = arith.constant 1.000000e+00 : f32
    %390 = vector.broadcast %cst_136 : f32 to vector<2x64xf32>
    %391 = arith.addf %390, %389 : vector<2x64xf32>
    %392 = arith.divf %390, %391 : vector<2x64xf32>
    %393 = vector.extract_strided_slice %386 {offsets = [0, 64], sizes = [2, 64], strides = [1, 1]} : vector<2x256xf32> to vector<2x64xf32>
    %394 = arith.negf %393 : vector<2x64xf32>
    %395 = math.exp %394 : vector<2x64xf32>
    %cst_137 = arith.constant 1.000000e+00 : f32
    %396 = vector.broadcast %cst_137 : f32 to vector<2x64xf32>
    %397 = arith.addf %396, %395 : vector<2x64xf32>
    %398 = arith.divf %396, %397 : vector<2x64xf32>
    %399 = vector.extract_strided_slice %386 {offsets = [0, 128], sizes = [2, 64], strides = [1, 1]} : vector<2x256xf32> to vector<2x64xf32>
    %400 = math.tanh %399 : vector<2x64xf32>
    %401 = vector.extract_strided_slice %386 {offsets = [0, 192], sizes = [2, 64], strides = [1, 1]} : vector<2x256xf32> to vector<2x64xf32>
    %402 = arith.negf %401 : vector<2x64xf32>
    %403 = math.exp %402 : vector<2x64xf32>
    %cst_138 = arith.constant 1.000000e+00 : f32
    %404 = vector.broadcast %cst_138 : f32 to vector<2x64xf32>
    %405 = arith.addf %404, %403 : vector<2x64xf32>
    %406 = arith.divf %404, %405 : vector<2x64xf32>
    %407 = arith.mulf %398, %378 : vector<2x64xf32>
    %408 = arith.mulf %392, %400 : vector<2x64xf32>
    %409 = arith.addf %407, %408 : vector<2x64xf32>
    %410 = math.tanh %409 : vector<2x64xf32>
    %411 = arith.mulf %406, %410 : vector<2x64xf32>
    %c6_139 = arith.constant 6 : index
    %c0_140 = arith.constant 0 : index
    %412 = vector.load %arg12[%c6_139, %c0_140] : memref<16x256xf32, #tpu.memory_space<vmem>>, vector<2x256xf32>
    %c8_141 = arith.constant 8 : index
    %c0_142 = arith.constant 0 : index
    %413 = vector.load %arg12[%c8_141, %c0_142] : memref<16x256xf32, #tpu.memory_space<vmem>>, vector<2x256xf32>
    %414 = arith.select %18, %412, %413 : vector<2x256xi1>, vector<2x256xf32>
    %cst_143 = arith.constant dense<0.000000e+00> : vector<2x256xf32>
    %415 = tpu.matmul %411, %310, %cst_143 {dimension_numbers = #tpu.dot_dimension_numbers<[1], [0], [0], [1], [0, 0, 1, 1], [], []>} : vector<2x64xf32>, vector<64x256xf32>, vector<2x256xf32> -> vector<2x256xf32>
    %416 = arith.addf %414, %415 : vector<2x256xf32>
    %417 = arith.addf %416, %313 : vector<2x256xf32>
    %418 = vector.extract_strided_slice %417 {offsets = [0, 0], sizes = [2, 64], strides = [1, 1]} : vector<2x256xf32> to vector<2x64xf32>
    %419 = arith.negf %418 : vector<2x64xf32>
    %420 = math.exp %419 : vector<2x64xf32>
    %cst_144 = arith.constant 1.000000e+00 : f32
    %421 = vector.broadcast %cst_144 : f32 to vector<2x64xf32>
    %422 = arith.addf %421, %420 : vector<2x64xf32>
    %423 = arith.divf %421, %422 : vector<2x64xf32>
    %424 = vector.extract_strided_slice %417 {offsets = [0, 64], sizes = [2, 64], strides = [1, 1]} : vector<2x256xf32> to vector<2x64xf32>
    %425 = arith.negf %424 : vector<2x64xf32>
    %426 = math.exp %425 : vector<2x64xf32>
    %cst_145 = arith.constant 1.000000e+00 : f32
    %427 = vector.broadcast %cst_145 : f32 to vector<2x64xf32>
    %428 = arith.addf %427, %426 : vector<2x64xf32>
    %429 = arith.divf %427, %428 : vector<2x64xf32>
    %430 = vector.extract_strided_slice %417 {offsets = [0, 128], sizes = [2, 64], strides = [1, 1]} : vector<2x256xf32> to vector<2x64xf32>
    %431 = math.tanh %430 : vector<2x64xf32>
    %432 = vector.extract_strided_slice %417 {offsets = [0, 192], sizes = [2, 64], strides = [1, 1]} : vector<2x256xf32> to vector<2x64xf32>
    %433 = arith.negf %432 : vector<2x64xf32>
    %434 = math.exp %433 : vector<2x64xf32>
    %cst_146 = arith.constant 1.000000e+00 : f32
    %435 = vector.broadcast %cst_146 : f32 to vector<2x64xf32>
    %436 = arith.addf %435, %434 : vector<2x64xf32>
    %437 = arith.divf %435, %436 : vector<2x64xf32>
    %438 = arith.mulf %429, %409 : vector<2x64xf32>
    %439 = arith.mulf %423, %431 : vector<2x64xf32>
    %440 = arith.addf %438, %439 : vector<2x64xf32>
    %441 = math.tanh %440 : vector<2x64xf32>
    %442 = arith.mulf %437, %441 : vector<2x64xf32>
    %c8_147 = arith.constant 8 : index
    %c0_148 = arith.constant 0 : index
    %443 = vector.load %arg12[%c8_147, %c0_148] : memref<16x256xf32, #tpu.memory_space<vmem>>, vector<2x256xf32>
    %c6_149 = arith.constant 6 : index
    %c0_150 = arith.constant 0 : index
    %444 = vector.load %arg12[%c6_149, %c0_150] : memref<16x256xf32, #tpu.memory_space<vmem>>, vector<2x256xf32>
    %445 = arith.select %18, %443, %444 : vector<2x256xi1>, vector<2x256xf32>
    %cst_151 = arith.constant dense<0.000000e+00> : vector<2x256xf32>
    %446 = tpu.matmul %442, %310, %cst_151 {dimension_numbers = #tpu.dot_dimension_numbers<[1], [0], [0], [1], [0, 0, 1, 1], [], []>} : vector<2x64xf32>, vector<64x256xf32>, vector<2x256xf32> -> vector<2x256xf32>
    %447 = arith.addf %445, %446 : vector<2x256xf32>
    %448 = arith.addf %447, %313 : vector<2x256xf32>
    %449 = vector.extract_strided_slice %448 {offsets = [0, 0], sizes = [2, 64], strides = [1, 1]} : vector<2x256xf32> to vector<2x64xf32>
    %450 = arith.negf %449 : vector<2x64xf32>
    %451 = math.exp %450 : vector<2x64xf32>
    %cst_152 = arith.constant 1.000000e+00 : f32
    %452 = vector.broadcast %cst_152 : f32 to vector<2x64xf32>
    %453 = arith.addf %452, %451 : vector<2x64xf32>
    %454 = arith.divf %452, %453 : vector<2x64xf32>
    %455 = vector.extract_strided_slice %448 {offsets = [0, 64], sizes = [2, 64], strides = [1, 1]} : vector<2x256xf32> to vector<2x64xf32>
    %456 = arith.negf %455 : vector<2x64xf32>
    %457 = math.exp %456 : vector<2x64xf32>
    %cst_153 = arith.constant 1.000000e+00 : f32
    %458 = vector.broadcast %cst_153 : f32 to vector<2x64xf32>
    %459 = arith.addf %458, %457 : vector<2x64xf32>
    %460 = arith.divf %458, %459 : vector<2x64xf32>
    %461 = vector.extract_strided_slice %448 {offsets = [0, 128], sizes = [2, 64], strides = [1, 1]} : vector<2x256xf32> to vector<2x64xf32>
    %462 = math.tanh %461 : vector<2x64xf32>
    %463 = vector.extract_strided_slice %448 {offsets = [0, 192], sizes = [2, 64], strides = [1, 1]} : vector<2x256xf32> to vector<2x64xf32>
    %464 = arith.negf %463 : vector<2x64xf32>
    %465 = math.exp %464 : vector<2x64xf32>
    %cst_154 = arith.constant 1.000000e+00 : f32
    %466 = vector.broadcast %cst_154 : f32 to vector<2x64xf32>
    %467 = arith.addf %466, %465 : vector<2x64xf32>
    %468 = arith.divf %466, %467 : vector<2x64xf32>
    %469 = arith.mulf %460, %440 : vector<2x64xf32>
    %470 = arith.mulf %454, %462 : vector<2x64xf32>
    %471 = arith.addf %469, %470 : vector<2x64xf32>
    %472 = math.tanh %471 : vector<2x64xf32>
    %473 = arith.mulf %468, %472 : vector<2x64xf32>
    %c10_155 = arith.constant 10 : index
    %c0_156 = arith.constant 0 : index
    %474 = vector.load %arg12[%c10_155, %c0_156] : memref<16x256xf32, #tpu.memory_space<vmem>>, vector<2x256xf32>
    %c4_157 = arith.constant 4 : index
    %c0_158 = arith.constant 0 : index
    %475 = vector.load %arg12[%c4_157, %c0_158] : memref<16x256xf32, #tpu.memory_space<vmem>>, vector<2x256xf32>
    %476 = arith.select %18, %474, %475 : vector<2x256xi1>, vector<2x256xf32>
    %cst_159 = arith.constant dense<0.000000e+00> : vector<2x256xf32>
    %477 = tpu.matmul %473, %310, %cst_159 {dimension_numbers = #tpu.dot_dimension_numbers<[1], [0], [0], [1], [0, 0, 1, 1], [], []>} : vector<2x64xf32>, vector<64x256xf32>, vector<2x256xf32> -> vector<2x256xf32>
    %478 = arith.addf %476, %477 : vector<2x256xf32>
    %479 = arith.addf %478, %313 : vector<2x256xf32>
    %480 = vector.extract_strided_slice %479 {offsets = [0, 0], sizes = [2, 64], strides = [1, 1]} : vector<2x256xf32> to vector<2x64xf32>
    %481 = arith.negf %480 : vector<2x64xf32>
    %482 = math.exp %481 : vector<2x64xf32>
    %cst_160 = arith.constant 1.000000e+00 : f32
    %483 = vector.broadcast %cst_160 : f32 to vector<2x64xf32>
    %484 = arith.addf %483, %482 : vector<2x64xf32>
    %485 = arith.divf %483, %484 : vector<2x64xf32>
    %486 = vector.extract_strided_slice %479 {offsets = [0, 64], sizes = [2, 64], strides = [1, 1]} : vector<2x256xf32> to vector<2x64xf32>
    %487 = arith.negf %486 : vector<2x64xf32>
    %488 = math.exp %487 : vector<2x64xf32>
    %cst_161 = arith.constant 1.000000e+00 : f32
    %489 = vector.broadcast %cst_161 : f32 to vector<2x64xf32>
    %490 = arith.addf %489, %488 : vector<2x64xf32>
    %491 = arith.divf %489, %490 : vector<2x64xf32>
    %492 = vector.extract_strided_slice %479 {offsets = [0, 128], sizes = [2, 64], strides = [1, 1]} : vector<2x256xf32> to vector<2x64xf32>
    %493 = math.tanh %492 : vector<2x64xf32>
    %494 = vector.extract_strided_slice %479 {offsets = [0, 192], sizes = [2, 64], strides = [1, 1]} : vector<2x256xf32> to vector<2x64xf32>
    %495 = arith.negf %494 : vector<2x64xf32>
    %496 = math.exp %495 : vector<2x64xf32>
    %cst_162 = arith.constant 1.000000e+00 : f32
    %497 = vector.broadcast %cst_162 : f32 to vector<2x64xf32>
    %498 = arith.addf %497, %496 : vector<2x64xf32>
    %499 = arith.divf %497, %498 : vector<2x64xf32>
    %500 = arith.mulf %491, %471 : vector<2x64xf32>
    %501 = arith.mulf %485, %493 : vector<2x64xf32>
    %502 = arith.addf %500, %501 : vector<2x64xf32>
    %503 = math.tanh %502 : vector<2x64xf32>
    %504 = arith.mulf %499, %503 : vector<2x64xf32>
    %c12_163 = arith.constant 12 : index
    %c0_164 = arith.constant 0 : index
    %505 = vector.load %arg12[%c12_163, %c0_164] : memref<16x256xf32, #tpu.memory_space<vmem>>, vector<2x256xf32>
    %c2_165 = arith.constant 2 : index
    %c0_166 = arith.constant 0 : index
    %506 = vector.load %arg12[%c2_165, %c0_166] : memref<16x256xf32, #tpu.memory_space<vmem>>, vector<2x256xf32>
    %507 = arith.select %18, %505, %506 : vector<2x256xi1>, vector<2x256xf32>
    %cst_167 = arith.constant dense<0.000000e+00> : vector<2x256xf32>
    %508 = tpu.matmul %504, %310, %cst_167 {dimension_numbers = #tpu.dot_dimension_numbers<[1], [0], [0], [1], [0, 0, 1, 1], [], []>} : vector<2x64xf32>, vector<64x256xf32>, vector<2x256xf32> -> vector<2x256xf32>
    %509 = arith.addf %507, %508 : vector<2x256xf32>
    %510 = arith.addf %509, %313 : vector<2x256xf32>
    %511 = vector.extract_strided_slice %510 {offsets = [0, 0], sizes = [2, 64], strides = [1, 1]} : vector<2x256xf32> to vector<2x64xf32>
    %512 = arith.negf %511 : vector<2x64xf32>
    %513 = math.exp %512 : vector<2x64xf32>
    %cst_168 = arith.constant 1.000000e+00 : f32
    %514 = vector.broadcast %cst_168 : f32 to vector<2x64xf32>
    %515 = arith.addf %514, %513 : vector<2x64xf32>
    %516 = arith.divf %514, %515 : vector<2x64xf32>
    %517 = vector.extract_strided_slice %510 {offsets = [0, 64], sizes = [2, 64], strides = [1, 1]} : vector<2x256xf32> to vector<2x64xf32>
    %518 = arith.negf %517 : vector<2x64xf32>
    %519 = math.exp %518 : vector<2x64xf32>
    %cst_169 = arith.constant 1.000000e+00 : f32
    %520 = vector.broadcast %cst_169 : f32 to vector<2x64xf32>
    %521 = arith.addf %520, %519 : vector<2x64xf32>
    %522 = arith.divf %520, %521 : vector<2x64xf32>
    %523 = vector.extract_strided_slice %510 {offsets = [0, 128], sizes = [2, 64], strides = [1, 1]} : vector<2x256xf32> to vector<2x64xf32>
    %524 = math.tanh %523 : vector<2x64xf32>
    %525 = vector.extract_strided_slice %510 {offsets = [0, 192], sizes = [2, 64], strides = [1, 1]} : vector<2x256xf32> to vector<2x64xf32>
    %526 = arith.negf %525 : vector<2x64xf32>
    %527 = math.exp %526 : vector<2x64xf32>
    %cst_170 = arith.constant 1.000000e+00 : f32
    %528 = vector.broadcast %cst_170 : f32 to vector<2x64xf32>
    %529 = arith.addf %528, %527 : vector<2x64xf32>
    %530 = arith.divf %528, %529 : vector<2x64xf32>
    %531 = arith.mulf %522, %502 : vector<2x64xf32>
    %532 = arith.mulf %516, %524 : vector<2x64xf32>
    %533 = arith.addf %531, %532 : vector<2x64xf32>
    %534 = math.tanh %533 : vector<2x64xf32>
    %535 = arith.mulf %530, %534 : vector<2x64xf32>
    %c14_171 = arith.constant 14 : index
    %c0_172 = arith.constant 0 : index
    %536 = vector.load %arg12[%c14_171, %c0_172] : memref<16x256xf32, #tpu.memory_space<vmem>>, vector<2x256xf32>
    %c0_173 = arith.constant 0 : index
    %c0_174 = arith.constant 0 : index
    %537 = vector.load %arg12[%c0_173, %c0_174] : memref<16x256xf32, #tpu.memory_space<vmem>>, vector<2x256xf32>
    %538 = arith.select %18, %536, %537 : vector<2x256xi1>, vector<2x256xf32>
    %cst_175 = arith.constant dense<0.000000e+00> : vector<2x256xf32>
    %539 = tpu.matmul %535, %310, %cst_175 {dimension_numbers = #tpu.dot_dimension_numbers<[1], [0], [0], [1], [0, 0, 1, 1], [], []>} : vector<2x64xf32>, vector<64x256xf32>, vector<2x256xf32> -> vector<2x256xf32>
    %540 = arith.addf %538, %539 : vector<2x256xf32>
    %541 = arith.addf %540, %313 : vector<2x256xf32>
    %542 = vector.extract_strided_slice %541 {offsets = [0, 0], sizes = [2, 64], strides = [1, 1]} : vector<2x256xf32> to vector<2x64xf32>
    %543 = arith.negf %542 : vector<2x64xf32>
    %544 = math.exp %543 : vector<2x64xf32>
    %cst_176 = arith.constant 1.000000e+00 : f32
    %545 = vector.broadcast %cst_176 : f32 to vector<2x64xf32>
    %546 = arith.addf %545, %544 : vector<2x64xf32>
    %547 = arith.divf %545, %546 : vector<2x64xf32>
    %548 = vector.extract_strided_slice %541 {offsets = [0, 64], sizes = [2, 64], strides = [1, 1]} : vector<2x256xf32> to vector<2x64xf32>
    %549 = arith.negf %548 : vector<2x64xf32>
    %550 = math.exp %549 : vector<2x64xf32>
    %cst_177 = arith.constant 1.000000e+00 : f32
    %551 = vector.broadcast %cst_177 : f32 to vector<2x64xf32>
    %552 = arith.addf %551, %550 : vector<2x64xf32>
    %553 = arith.divf %551, %552 : vector<2x64xf32>
    %554 = vector.extract_strided_slice %541 {offsets = [0, 128], sizes = [2, 64], strides = [1, 1]} : vector<2x256xf32> to vector<2x64xf32>
    %555 = math.tanh %554 : vector<2x64xf32>
    %556 = vector.extract_strided_slice %541 {offsets = [0, 192], sizes = [2, 64], strides = [1, 1]} : vector<2x256xf32> to vector<2x64xf32>
    %557 = arith.negf %556 : vector<2x64xf32>
    %558 = math.exp %557 : vector<2x64xf32>
    %cst_178 = arith.constant 1.000000e+00 : f32
    %559 = vector.broadcast %cst_178 : f32 to vector<2x64xf32>
    %560 = arith.addf %559, %558 : vector<2x64xf32>
    %561 = arith.divf %559, %560 : vector<2x64xf32>
    %562 = arith.mulf %553, %533 : vector<2x64xf32>
    %563 = arith.mulf %547, %555 : vector<2x64xf32>
    %564 = arith.addf %562, %563 : vector<2x64xf32>
    %565 = math.tanh %564 : vector<2x64xf32>
    %566 = arith.mulf %561, %565 : vector<2x64xf32>
    %567 = tpu.concatenate %304, %566 in 1 : vector<2x64xf32>, vector<2x64xf32> -> vector<2x128xf32>
    %c0_179 = arith.constant 0 : index
    %c0_180 = arith.constant 0 : index
    %568 = vector.load %arg7[%c0_179, %c0_180] : memref<128x32xf32, #tpu.memory_space<vmem>>, vector<128x32xf32>
    %cst_181 = arith.constant dense<0.000000e+00> : vector<2x32xf32>
    %569 = tpu.matmul %567, %568, %cst_181 {dimension_numbers = #tpu.dot_dimension_numbers<[1], [0], [0], [1], [0, 0, 1, 1], [], []>} : vector<2x128xf32>, vector<128x32xf32>, vector<2x32xf32> -> vector<2x32xf32>
    %c0_182 = arith.constant 0 : index
    %c0_183 = arith.constant 0 : index
    %570 = vector.load %arg8[%c0_182, %c0_183] : memref<1x32xf32, #tpu.memory_space<vmem>>, vector<1x32xf32>
    %571 = vector.broadcast %570 : vector<1x32xf32> to vector<2x32xf32>
    %572 = arith.addf %569, %571 : vector<2x32xf32>
    %c0_184 = arith.constant 0 : index
    %c0_185 = arith.constant 0 : index
    %573 = vector.load %arg9[%c0_184, %c0_185] : memref<32x1xf32, #tpu.memory_space<vmem>>, vector<32x1xf32>
    %cst_186 = arith.constant dense<0.000000e+00> : vector<2x1xf32>
    %574 = tpu.matmul %572, %573, %cst_186 {dimension_numbers = #tpu.dot_dimension_numbers<[1], [0], [0], [1], [0, 0, 1, 1], [], []>} : vector<2x32xf32>, vector<32x1xf32>, vector<2x1xf32> -> vector<2x1xf32>
    %c0_187 = arith.constant 0 : index
    %c0_188 = arith.constant 0 : index
    %575 = vector.load %arg10[%c0_187, %c0_188] : memref<1x1xf32, #tpu.memory_space<vmem>>, vector<1x1xf32>
    %576 = vector.broadcast %575 : vector<1x1xf32> to vector<2x1xf32>
    %577 = arith.addf %574, %576 : vector<2x1xf32>
    %c0_189 = arith.constant 0 : index
    %c0_190 = arith.constant 0 : index
    %578 = vector.load %arg11[%c0_189, %c0_190] : memref<2x1xf32, #tpu.memory_space<vmem>>, vector<2x1xf32>
    tpu.vector_store %arg11[%c0_189, %c0_190], %577 {strides = array<i32>} : memref<2x1xf32, #tpu.memory_space<vmem>>, vector<2x1xf32>,
    return
  }
}

</mosaic_0001>

<bundles_post_ra>
// kernel: bilstm_2fc_forward.1
= control target key start
LH: loop header
LB: loop body
LE: loop exit
PB: predicated region body
PF: predicated region fallthrough
CT: control target
= control target key end

     0   :  { %s3995_s0 = inlined_call_operand.vmem [shape: f32[16,32], index: 0, kind: input, shape index: {}]   ;;  %s3996_s1 = inlined_call_operand.hbm [shape: f32[32,256], index: 1, kind: input, shape index: {}]   ;;  %s3997_s2 = inlined_call_operand.vmem [shape: f32[64,256], index: 2, kind: input, shape index: {}]   ;;  %s3998_s3 = inlined_call_operand.vmem [shape: f32[1,256], index: 3, kind: input, shape index: {}]   ;;  %s3999_s4 = inlined_call_operand.vmem [shape: f32[64,256], index: 4, kind: input, shape index: {}]   ;;  %s4000_s5 = inlined_call_operand.vmem [shape: f32[64,256], index: 5, kind: input, shape index: {}]   ;;  %s4001_s6 = inlined_call_operand.vmem [shape: f32[1,256], index: 6, kind: input, shape index: {}]   ;;  %s4002_s7 = inlined_call_operand.vmem [shape: f32[128,32], index: 7, kind: input, shape index: {}]   ;;  %s4003_s8 = inlined_call_operand.hbm [shape: f32[1,32], index: 8, kind: input, shape index: {}]   ;;  %s4004_s9 = inlined_call_operand.vmem [shape: f32[32,1], index: 9, kind: input, shape index: {}]   ;;  %s4005_s10 = inlined_call_operand.<no memory space> [shape: f32[1,1], index: 10, kind: input, shape index: {}]   ;;  %s4006_s11 = inlined_call_operand.vmem [shape: f32[2,1], index: 11, kind: output, shape index: {}]  }
   0x1   :  { %v16_v0 = vstv %s4005_s10 }
   0x2   :  { %17 = vst [vmem:[#allocation4] sm:$0x1] %v16_v0 }
   0x3   :  { %18 = vsyncpa [#allocation6], 0 }
   0x4   :  { %19 = vsyncpa [#allocation8], 0  ;;  %s3193_s19 = smov [#allocation5]   ;;  %s3145_s23 = scalar_lea.hbm %s3996_s1, 1024 }
   0x5   :  { %s27_s20 = sshll.u32 %s3193_s19, 4  ;;  %p3146_p0 = scmp.ne.s32.totalorder %s3996_s1, %s3145_s23  ;;  %s28_s20 = int_to_ptr.vmem [resolvable:$true] %s27_s20 }
   0x6   :  { %p3149_p1 = scmp.lt.u32.totalorder %s3145_s23, %s3996_s1 }
   0x8   :  { %p3151_p2 = pnand %p3149_p1, %p3146_p0 }
   0xa   :  { %3154 = shalt.err (!%p3151_p2)
}
   0xb   :  { %s3155_s10 = scalar_lea.vmem %s28_s20, 1024  ;;  %p3160_p4 = scmp.lt.s32.totalorder %s28_s20, %s28_s20 }
   0xc   :  { %p3156_p3 = scmp.ne.s32.totalorder %s28_s20, %s3155_s10  ;;  %p3161_p5 = scmp.lt.s32.totalorder %s3155_s10, %s3155_s10 }
   0xe   :  { %p3162_p6 = por %p3161_p5, %p3160_p4 }
  0x10   :  { %p3163_p7 = pnand %p3162_p6, %p3156_p3 }
  0x12   :  { %3166 = shalt.err (!%p3163_p7)
}
  0x13   :  { %s3194_s28 = smov 256   ;;  %s3195_s29 = smov 16  }
  0x14   :  { %33 = dma.hbm_to_vmem [thread:$0]  %s3996_s1, 1024, %s28_s20, [#allocation6], %s3194_s28, %s3194_s28, %s3195_s29  }
  0x15   :  { %s3196_s13 = smov [#allocation7]   ;;  %s3167_s17 = scalar_lea.hbm %s4003_s8, 16 }
  0x16   :  { %s52_s14 = sshll.u32 %s3196_s13, 4  ;;  %p3168_p8 = scmp.ne.s32.totalorder %s4003_s8, %s3167_s17  ;;  %s53_s14 = int_to_ptr.vmem [resolvable:$true] %s52_s14 }
  0x17   :  { %p3171_p9 = scmp.lt.u32.totalorder %s3167_s17, %s4003_s8 }
  0x19   :  { %p3173_p10 = pnand %p3171_p9, %p3168_p8 }
  0x1b   :  { %3176 = shalt.err (!%p3173_p10)
}
  0x1c   :  { %s3177_s23 = scalar_lea.vmem %s53_s14, 16  ;;  %s3181_s1 = scalar_lea.vmem %s53_s14, 32 }
  0x1d   :  { %p3178_p11 = scmp.ne.s32.totalorder %s53_s14, %s3177_s23  ;;  %p3182_p12 = scmp.lt.s32.totalorder %s53_s14, %s53_s14 }
  0x1e   :  { %p3183_p13 = scmp.lt.s32.totalorder %s3181_s1, %s3177_s23 }
  0x20   :  { %p3184_p0 = por %p3183_p13, %p3182_p12 }
  0x22   :  { %p3185_p1 = pnand %p3184_p0, %p3178_p11 }
  0x24   :  { %3188 = shalt.err (!%p3185_p1)
}
  0x25   :  { %55 = dma.hbm_to_vmem [thread:$0]  %s4003_s8, 16, %s53_s14, [#allocation8]  }
  0x26   :  { %3189 = dma.done.wait [#allocation6], 1024  }
  0x27   :  { %3190 = vsyncadd [#allocation6], 4294966272 }
  0x28   :  { %3191 = dma.done.wait [#allocation8], 16  }
  0x29   :  { %3192 = vsyncadd [#allocation8], 4294967280  ;;  %v3197_v1 = vmov 0.0   ;;  %v126_v2 = vld [vmem:[#allocation5 + $0x8] sm:$0xff]  ;;  %v128_v3 = vld [vmem:[#allocation5 + $0x18] sm:$0xff]  ;;  %vm133_vm0 = vcmask 261120   ;;  %v66_v42 = vlaneseq }
  0x2a   :  { %204 = vmatprep.mubr.f32.mxu1 %v3197_v1  ;;  %420 = vmatprep.mubr.f32.mxu0 %v3197_v1  ;;  %v125_v4 = vld [vmem:[#allocation5] sm:$0xff]  ;;  %v2635_v5 = vpack.c.bf16 %v128_v3, %v126_v2  ;;  %v127_v6 = vld [vmem:[#allocation5 + $0x10] sm:$0xff]  ;;  %v130_v7 = vld [vmem:[#allocation5 + $0x28] sm:$0xff]  ;;  %vm338_vm3 = vcmask 254976   ;;  %vm340_vm4 = vcmask 517376   ;;  %vm233_vm5 = vcmask 523264  }
  0x2b   :  { %v132_v8 = vld [vmem:[#allocation5 + $0x38] sm:$0xff]  ;;  %v2637_v9 = vpack.c.bf16 %v127_v6, %v125_v4  ;;  %v129_v11 = vld [vmem:[#allocation5 + $0x20] sm:$0xff]  ;;  %v131_v12 = vld [vmem:[#allocation5 + $0x30] sm:$0xff]  ;;  %v67_v45 = vand.u32 127, %v66_v42  ;;  %v3392_v46 = vshrl.u32 %v66_v42, 7  ;;  %vm466_vm6 = vcmask 257026  }
  0x2c   :  { %v2639_v10 = vpack.c.bf16 %v132_v8, %v130_v7  ;;  %2636 = vmatprep.subr.bf16.mxu1 %v2635_v5  ;;  %v98_v13 = vld [vmem:[%s3997_s2 + $0x8] sm:$0xff]  ;;  %v100_v14 = vld [vmem:[%s3997_s2 + $0x18] sm:$0xff]  ;;  %v97_v15 = vld [vmem:[%s3997_s2] sm:$0xff]  ;;  %v2641_v16 = vpack.c.bf16 %v131_v12, %v129_v11  ;;  %vm468_vm7 = vcmask 519426   ;;  %vm728_vm8 = vcmask 261126  }
  0x2d   :  { %2638 = vmatpush1.bf16.msra.mxu1 %v2637_v9  ;;  %v3299_v17 = vpack.c.bf16 %v100_v14, %v98_v13  ;;  %v99_v18 = vld [vmem:[%s3997_s2 + $0x10] sm:$0xff]  ;;  %v102_v19 = vld [vmem:[%s3997_s2 + $0x28] sm:$0xff]  ;;  %v104_v21 = vld [vmem:[%s3997_s2 + $0x38] sm:$0xff]  ;;  %v73_v47 = vand.u32 63, %v67_v45  ;;  %v117_v48 = vsub.s32 0, %v3392_v46  ;;  %v68_v54 = vadd.s32 128, %v67_v45 }
  0x2e   :  { %2640 = vmatprep.subr.bf16.mxu1 %v2639_v10  ;;  %v3307_v20 = vpack.c.bf16 %v99_v18, %v97_v15  ;;  %v3312_v22 = vpack.c.bf16 %v104_v21, %v102_v19  ;;  %v101_v23 = vld [vmem:[%s3997_s2 + $0x20] sm:$0xff]  ;;  %v103_v24 = vld [vmem:[%s3997_s2 + $0x30] sm:$0xff]  ;;  %v106_v26 = vld [vmem:[%s3997_s2 + $0x48] sm:$0xff]  ;;  %v121_v3 = vsub.s32 1, %v3392_v46  ;;  %vm730_vm9 = vcmask 523526  }
  0x2f   :  { %2660 = vmatprep.subr.bf16.mxu0 %v3299_v17  ;;  %v95_v25 = vld [vmem:[%s3995_s0] sm:$0xff]  ;;  %v108_v27 = vld [vmem:[%s3997_s2 + $0x58] sm:$0xff]  ;;  %v3333_v28 = vpack.c.bf16 %v103_v24, %v101_v23  ;;  %v107_v30 = vld [vmem:[%s3997_s2 + $0x50] sm:$0xff]  ;;  %vm3398_vm1 = vcmp.lt.s32.totalorder %v73_v47, 32  ;;  %v80_v61 = vand.u32 63, %v68_v54  ;;  %vm597_vm10 = vcmask 259076  }
  0x30   :  { %2662 = vmatpush1.bf16.msra.mxu0 %v3307_v20  ;;  %v105_v29 = vld [vmem:[%s3997_s2 + $0x40] sm:$0xff]  ;;  %v3342_v31 = vpack.c.bf16 %v108_v27, %v106_v26  ;;  %v96_v32 = vld [vmem:[%s3995_s0 + $0x8] sm:$0xff]  ;;  %v112_v34 = vld [vmem:[%s3997_s2 + $0x78] sm:$0xff]  ;;  %vm599_vm11 = vcmask 521476   ;;  %vm3200_vm12 = vmmov 0   ;;  %vm2506_vm13 = vcmask 1024  }
  0x31   :  { %2642 = vmatpush1.bf16.msra.mxu1 %v2641_v16  ;;  %2664 = vmatprep.subr.bf16.mxu0 %v3312_v22  ;;  %v110_v33 = vld [vmem:[%s3997_s2 + $0x68] sm:$0xff]  ;;  %v3357_v35 = vpack.c.bf16 %v107_v30, %v105_v29  ;;  %v109_v36 = vld [vmem:[%s3997_s2 + $0x60] sm:$0xff]  ;;  %v111_v37 = vld [vmem:[%s3997_s2 + $0x70] sm:$0xff]  ;;  %vm3409_vm2 = vcmp.lt.s32.totalorder %v80_v61, 32 }
  0x32   :  { %2644 = vmatprep.subr.bf16.mxu1 %v3299_v17  ;;  %v3367_v38 = vpack.c.bf16 %v112_v34, %v110_v33  ;;  %v3373_v39 = vpack.c.bf16 %v111_v37, %v109_v36  ;;  %v113_v49 = vld [vmem:[%s3998_s3] sm:$0x3]  ;;  %s3198_s3 = smov 64  }
  0x33   :  { %v3404_v55 = vrot.slane %v113_v49, %v117_v48  ;;  %v3418_v6 = vrot.slane %v113_v49, %v121_v3 }
  0x34   :  { %2514 = vmatmul.mubr.msk.f32.vlgmr.msra.gmra.mrb[0].mxu1 %vm133_vm0, %v95_v25  ;;  %2666 = vmatpush1.bf16.msra.mxu0 %v3333_v28 }
  0x35   :  { %2646 = vmatpush1.bf16.msra.mxu1 %v3307_v20  ;;  %210 = vmatprep.mubr.f32.mxu1 %v3197_v1 }
  0x36   :  { %2648 = vmatprep.subr.bf16.mxu1 %v3312_v22  ;;  %2668 = vmatprep.subr.bf16.mxu0 %v3342_v31 }
  0x38   :  { %2515 = vmatmul.mubr.msk.f32.gmra.mrb[2].mxu1 %vm133_vm0, %v96_v32  ;;  %2670 = vmatpush1.bf16.msra.mxu0 %v3357_v35 }
  0x39   :  { %2650 = vmatpush1.bf16.msra.mxu1 %v3333_v28  ;;  %301 = vmatprep.mubr.f32.mxu1 %v3197_v1 }
  0x3a   :  { %2652 = vmatprep.subr.bf16.mxu1 %v3342_v31  ;;  %2672 = vmatprep.subr.bf16.mxu0 %v3367_v38 }
  0x3c   :  { %2674 = vmatpush1.bf16.msra.mxu0 %v3373_v39 }
  0x3d   :  { %2654 = vmatpush1.bf16.msra.mxu1 %v3357_v35  ;;  %2692 = vmatprep.subr.bf16.mxu0 %v3299_v17 }
  0x3e   :  { %2656 = vmatprep.subr.bf16.mxu1 %v3367_v38 }
  0x41   :  { %2658 = vmatpush1.bf16.msra.mxu1 %v3373_v39 }
  0x42   :  { %2676 = vmatprep.subr.bf16.mxu1 %v3299_v17 }
  0x44   :  { %302 = vmatmul.mubr.f32.vlgmr.msra.gmra.mrb[4].mxu1 %v3197_v1 }
  0x45   :  { %2678 = vmatpush1.bf16.msra.mxu1 %v3307_v20  ;;  %551 = vmatprep.mubr.f32.mxu1 %v3197_v1 }
  0x46   :  { %2680 = vmatprep.subr.bf16.mxu1 %v3312_v22 }
  0x49   :  { %2682 = vmatpush1.bf16.msra.mxu1 %v3333_v28 }
  0x4a   :  { %2684 = vmatprep.subr.bf16.mxu1 %v3342_v31 }
  0x4d   :  { %2686 = vmatpush1.bf16.msra.mxu1 %v3357_v35 }
  0x4e   :  { %2688 = vmatprep.subr.bf16.mxu1 %v3367_v38 }
  0x51   :  { %2690 = vmatpush1.bf16.msra.mxu1 %v3373_v39 }
  0x52   :  { %2708 = vmatprep.subr.bf16.mxu1 %v3299_v17 }
 0x107   :  { %v206_v40 = vpop.f32.mrb[0].mxu1 }
 0x108   :  { %217 = vst [vmem:[#allocation2] sm:$0xff] %v206_v40  ;;  %v208_v41 = vpop.f32.mrb[1].mxu1 }
 0x109   :  { %218 = vst [vmem:[#allocation2 + $0x8] sm:$0xff] %v208_v41 }
 0x10b   :  { %v212_v43 = vpop.f32.mrb[2].mxu1 }
 0x10c   :  { %219 = vst [vmem:[#allocation2 + $0x10] sm:$0xff] %v212_v43  ;;  %v214_v44 = vpop.f32.mrb[3].mxu1 }
 0x10d   :  { %220 = vst [vmem:[#allocation2 + $0x18] sm:$0xff] %v214_v44 }
 0x10f   :  { %v221_v53 = vld [vmem:[#allocation2] sm:$0x3]  ;;  %v342_v32 = vld [vmem:[#allocation2] sm:$0xc] }
 0x110   :  { %v222_v4 = vld [vmem:[#allocation2 + $0x8] sm:$0x3]  ;;  %v343_v45 = vld [vmem:[#allocation2 + $0x8] sm:$0xc] }
 0x113   :  { %v223_v50 = vld [vmem:[#allocation2 + $0x10] sm:$0xc0]  ;;  %v344_v27 = vld [vmem:[#allocation2 + $0x10] sm:$0x30] }
 0x114   :  { %v227_v51 = vrot.slane %v223_v50, 6  ;;  %v224_v59 = vld [vmem:[#allocation2 + $0x18] sm:$0xc0]  ;;  %v348_v29 = vrot.slane %v344_v27, 2  ;;  %v345_v41 = vld [vmem:[#allocation2 + $0x18] sm:$0x30] }
 0x115   :  { %v228_v63 = vrot.slane %v224_v59, 6  ;;  %v349_v43 = vrot.slane %v345_v41, 2 }
 0x116   :  { %v231_v56 = vsel %vm3398_vm1, %v221_v53, %v227_v51  ;;  %v352_v36 = vsel %vm3398_vm1, %v342_v32, %v348_v29 }
 0x117   :  { %v303_v57 = vpop.f32.mrb[4].mxu1  ;;  %v232_v5 = vsel %vm3409_vm2, %v222_v4, %v228_v63  ;;  %v353_v47 = vsel %vm3409_vm2, %v343_v45, %v349_v43 }
 0x118   :  { %v308_v58 = vadd.f32 %v303_v57, %v231_v56  ;;  %v305_v60 = vpop.f32.mrb[5].mxu1 }
 0x119   :  { %v309_v7 = vadd.f32 %v305_v60, %v232_v5 }
 0x11a   :  { %v310_v62 = vadd.f32 %v308_v58, %v3404_v55 }
 0x11b   :  { %v311_v8 = vadd.f32 %v309_v7, %v3418_v6 }
 0x11c   :  { %v2516_v0 = vmul.f32 -1.442695, %v310_v62 }
 0x11d   :  { %v2517_v14 = vmul.f32 -1.442695, %v311_v8 }
 0x11e   :  { %2953 = vpow2.f32 %v2516_v0 }
 0x11f   :  { %2955 = vtanh.f32 %v311_v8 }
 0x128   :  { %v2954_v9 = vpop.eup %2953 }
 0x129   :  { %v315_v10 = vadd.f32 1.0, %v2954_v9  ;;  %v2956_v11 = vpop.eup %2955 }
 0x12b   :  { %2957 = vrcp.f32 %v315_v10  ;;  %v472_v10 = vld [vmem:[#allocation2 + $0x10] sm:$0xc] }
 0x12c   :  { %2959 = vpow2.f32 %v2517_v14 }
 0x135   :  { %v2958_v12 = vpop.eup %2957 }
 0x136   :  { %v326_v13 = vmul.f32 %v2958_v12, %v2956_v11  ;;  %v2960_v15 = vpop.eup %2959  ;;  %v325_v18 = vmul.f32 0.0, %v2958_v12  ;;  %v476_v11 = vrot.slane %v472_v10, 6  ;;  %v602_v10 = vld [vmem:[#allocation2 + $0x8] sm:$0xc0] }
 0x137   :  { %v322_v16 = vadd.f32 1.0, %v2960_v15 }
 0x138   :  { %328 = vrot.lane.b32.xlu0 %v326_v13, %s3198_s3  ;;  %v470_v13 = vld [vmem:[#allocation2] sm:$0x30] }
 0x139   :  { %2961 = vrcp.f32 %v322_v16  ;;  %v480_v16 = vsel %vm3398_vm1, %v470_v13, %v476_v11 }
 0x143   :  { %v2962_v23 = vpop.eup %2961 }
 0x1aa   :  { %v329_v19 = vpop.permute.xlu0 %328 }
 0x1ab   :  { %v331_v21 = vadd.f32 %v329_v19, %v325_v18 }
 0x1ad   :  { %2963 = vtanh.f32 %v331_v21  ;;  %v451_v56 = vrot.slane %v331_v21, 6  ;;  %v473_v21 = vld [vmem:[#allocation2 + $0x18] sm:$0xc] }
 0x1b7   :  { %v2964_v24 = vpop.eup %2963 }
 0x1b8   :  { %v333_v25 = vmul.f32 %v2964_v24, %v2962_v23  ;;  %v477_v24 = vrot.slane %v473_v21, 6 }
 0x1ba   :  { %335 = vrot.lane.b32.xlu0 %v333_v25, %s3198_s3 }
 0x22c   :  { %v336_v26 = vpop.permute.xlu0 %335 }
 0x22d   :  { %339 = vst.msk [vmem:[#allocation3] sm:$0x3] %vm338_vm3, %v336_v26  ;;  %2518 = vmatmul.mubr.msk.f32.vlgmr.msra.gmra.mrb[0].mxu0 %vm233_vm5, %v336_v26 }
 0x22e   :  { %341 = vst.msk [vmem:[#allocation3 + $0xe] sm:$0x3] %vm340_vm4, %v336_v26  ;;  %2694 = vmatpush1.bf16.msra.mxu0 %v3307_v20  ;;  %682 = vmatprep.mubr.f32.mxu0 %v3197_v1  ;;  %v471_v26 = vld [vmem:[#allocation2 + $0x8] sm:$0x30] }
 0x22f   :  { %2696 = vmatprep.subr.bf16.mxu0 %v3312_v22  ;;  %v481_v27 = vsel %vm3409_vm2, %v471_v26, %v477_v24 }
 0x232   :  { %2698 = vmatpush1.bf16.msra.mxu0 %v3333_v28 }
 0x233   :  { %2700 = vmatprep.subr.bf16.mxu0 %v3342_v31 }
 0x236   :  { %2702 = vmatpush1.bf16.msra.mxu0 %v3357_v35 }
 0x237   :  { %2704 = vmatprep.subr.bf16.mxu0 %v3367_v38 }
 0x23a   :  { %2706 = vmatpush1.bf16.msra.mxu0 %v3373_v39 }
 0x23b   :  { %2724 = vmatprep.subr.bf16.mxu0 %v3299_v17 }
 0x300   :  { %v422_v30 = vpop.f32.mrb[0].mxu0 }
 0x301   :  { %v429_v33 = vrot.slane %v422_v30, 6  ;;  %v424_v34 = vpop.f32.mrb[1].mxu0 }
 0x302   :  { %v430_v44 = vrot.slane %v424_v34, 6 }
 0x303   :  { %v433_v37 = vadd.f32 %v429_v33, %v352_v36 }
 0x304   :  { %v434_v49 = vadd.f32 %v430_v44, %v353_v47 }
 0x305   :  { %v435_v40 = vadd.f32 %v433_v37, %v3404_v55 }
 0x306   :  { %v436_v50 = vadd.f32 %v434_v49, %v3418_v6 }
 0x307   :  { %v2519_v42 = vmul.f32 -1.442695, %v435_v40 }
 0x308   :  { %v2520_v60 = vmul.f32 -1.442695, %v436_v50 }
 0x309   :  { %2965 = vpow2.f32 %v2519_v42 }
 0x30a   :  { %2967 = vtanh.f32 %v436_v50 }
 0x313   :  { %v2966_v51 = vpop.eup %2965 }
 0x314   :  { %v440_v53 = vadd.f32 1.0, %v2966_v51  ;;  %v2968_v54 = vpop.eup %2967 }
 0x316   :  { %2969 = vrcp.f32 %v440_v53 }
 0x317   :  { %2971 = vpow2.f32 %v2520_v60 }
 0x320   :  { %v2970_v57 = vpop.eup %2969 }
 0x321   :  { %v454_v58 = vmul.f32 %v2970_v57, %v2968_v54  ;;  %v453_v59 = vmul.f32 %v2970_v57, %v451_v56  ;;  %v2972_v61 = vpop.eup %2971  ;;  %v603_v56 = vld [vmem:[#allocation2 + $0x10] sm:$0x3] }
 0x322   :  { %v447_v62 = vadd.f32 1.0, %v2972_v61  ;;  %v607_v57 = vrot.slane %v603_v56, 2 }
 0x323   :  { %456 = vrot.lane.b32.xlu1 %v454_v58, %s3198_s3 }
 0x324   :  { %2973 = vrcp.f32 %v447_v62 }
 0x32e   :  { %v2974_v4 = vpop.eup %2973 }
 0x395   :  { %v457_v63 = vpop.permute.xlu1 %456 }
 0x396   :  { %v459_v0 = vadd.f32 %v457_v63, %v453_v59  ;;  %v601_v59 = vld [vmem:[#allocation2] sm:$0xc0] }
 0x397   :  { %v611_v62 = vsel %vm3398_vm1, %v601_v59, %v607_v57 }
 0x398   :  { %2975 = vtanh.f32 %v459_v0  ;;  %v582_v36 = vrot.slane %v459_v0, 6 }
 0x3a2   :  { %v2976_v5 = vpop.eup %2975 }
 0x3a3   :  { %v3442_v7 = vmul.f32 %v2976_v5, %v2974_v4  ;;  %v604_v4 = vld [vmem:[#allocation2 + $0x18] sm:$0x3] }
 0x3a5   :  { %v482_v8 = vrot.slane %v3442_v7, 2 }
 0x3a7   :  { %483 = vrot.lane.b32.xlu1 %v482_v8, %s3198_s3  ;;  %v608_v8 = vrot.slane %v604_v4, 2 }
 0x419   :  { %v484_v9 = vpop.permute.xlu1 %483 }
 0x41a   :  { %2521 = vmatmul.mubr.msk.f32.vlgmr.msra.gmra.mrb[6].mxu1 %vm233_vm5, %v484_v9 }
 0x41b   :  { %2710 = vmatpush1.bf16.msra.mxu1 %v3307_v20  ;;  %813 = vmatprep.mubr.f32.mxu1 %v3197_v1 }
 0x41c   :  { %2712 = vmatprep.subr.bf16.mxu1 %v3312_v22 }
 0x41f   :  { %2714 = vmatpush1.bf16.msra.mxu1 %v3333_v28 }
 0x420   :  { %2716 = vmatprep.subr.bf16.mxu1 %v3342_v31 }
 0x423   :  { %2718 = vmatpush1.bf16.msra.mxu1 %v3357_v35 }
 0x424   :  { %2720 = vmatprep.subr.bf16.mxu1 %v3367_v38 }
 0x427   :  { %2722 = vmatpush1.bf16.msra.mxu1 %v3373_v39 }
 0x428   :  { %2740 = vmatprep.subr.bf16.mxu1 %v3299_v17 }
 0x4ed   :  { %v553_v12 = vpop.f32.mrb[6].mxu1 }
 0x4ee   :  { %v560_v14 = vrot.slane %v553_v12, 4  ;;  %v555_v15 = vpop.f32.mrb[7].mxu1 }
 0x4ef   :  { %v561_v25 = vrot.slane %v555_v15, 4 }
 0x4f0   :  { %v564_v18 = vadd.f32 %v560_v14, %v480_v16 }
 0x4f1   :  { %v565_v29 = vadd.f32 %v561_v25, %v481_v27 }
 0x4f2   :  { %v566_v19 = vadd.f32 %v564_v18, %v3404_v55 }
 0x4f3   :  { %v567_v30 = vadd.f32 %v565_v29, %v3418_v6 }
 0x4f4   :  { %v2522_v23 = vmul.f32 -1.442695, %v566_v19 }
 0x4f5   :  { %v2523_v42 = vmul.f32 -1.442695, %v567_v30 }
 0x4f6   :  { %2977 = vpow2.f32 %v2522_v23 }
 0x4f7   :  { %2979 = vtanh.f32 %v567_v30 }
 0x500   :  { %v2978_v32 = vpop.eup %2977 }
 0x501   :  { %v571_v33 = vadd.f32 1.0, %v2978_v32  ;;  %v2980_v34 = vpop.eup %2979 }
 0x503   :  { %2981 = vrcp.f32 %v571_v33 }
 0x504   :  { %2983 = vpow2.f32 %v2523_v42 }
 0x50d   :  { %v2982_v37 = vpop.eup %2981 }
 0x50e   :  { %v585_v40 = vmul.f32 %v2982_v37, %v2980_v34  ;;  %v584_v41 = vmul.f32 %v2982_v37, %v582_v36  ;;  %v2984_v43 = vpop.eup %2983  ;;  %v734_v36 = vld [vmem:[#allocation2] sm:$0xc0] }
 0x50f   :  { %v578_v44 = vadd.f32 1.0, %v2984_v43  ;;  %v738_v37 = vrot.slane %v734_v36, 6 }
 0x510   :  { %587 = vrot.lane.b32.xlu0 %v585_v40, %s3198_s3  ;;  %v732_v40 = vld [vmem:[#allocation2 + $0x10] sm:$0x3] }
 0x511   :  { %2985 = vrcp.f32 %v578_v44 }
 0x51b   :  { %v2986_v49 = vpop.eup %2985 }
 0x582   :  { %v588_v45 = vpop.permute.xlu0 %587 }
 0x583   :  { %v590_v47 = vadd.f32 %v588_v45, %v584_v41  ;;  %v742_v41 = vsel %vm3398_vm1, %v732_v40, %v738_v37 }
 0x585   :  { %2987 = vtanh.f32 %v590_v47  ;;  %v713_v16 = vrot.slane %v590_v47, 6 }
 0x58f   :  { %v2988_v50 = vpop.eup %2987 }
 0x590   :  { %v3463_v51 = vmul.f32 %v2988_v50, %v2986_v49  ;;  %v735_v49 = vld [vmem:[#allocation2 + $0x8] sm:$0xc0]  ;;  %v733_v50 = vld [vmem:[#allocation2 + $0x18] sm:$0x3] }
 0x592   :  { %v613_v53 = vrot.slane %v3463_v51, 4 }
 0x594   :  { %614 = vrot.lane.b32.xlu1 %v613_v53, %s3198_s3  ;;  %v739_v53 = vrot.slane %v735_v49, 6 }
 0x606   :  { %v615_v54 = vpop.permute.xlu1 %614 }
 0x607   :  { %2524 = vmatmul.mubr.msk.f32.vlgmr.msra.gmra.mrb[2].mxu0 %vm233_vm5, %v615_v54  ;;  %v743_v54 = vsel %vm3409_vm2, %v733_v50, %v739_v53 }
 0x608   :  { %2726 = vmatpush1.bf16.msra.mxu0 %v3307_v20  ;;  %933 = vmatprep.mubr.f32.mxu0 %v3197_v1 }
 0x609   :  { %2728 = vmatprep.subr.bf16.mxu0 %v3312_v22 }
 0x60c   :  { %2730 = vmatpush1.bf16.msra.mxu0 %v3333_v28 }
 0x60d   :  { %2732 = vmatprep.subr.bf16.mxu0 %v3342_v31 }
 0x610   :  { %2734 = vmatpush1.bf16.msra.mxu0 %v3357_v35 }
 0x611   :  { %2736 = vmatprep.subr.bf16.mxu0 %v3367_v38 }
 0x614   :  { %2738 = vmatpush1.bf16.msra.mxu0 %v3373_v39 }
 0x615   :  { %2756 = vmatprep.subr.bf16.mxu0 %v3299_v17  ;;  %v612_v17 = vsel %vm3409_vm2, %v602_v10, %v608_v8 }
 0x6da   :  { %v684_v58 = vpop.f32.mrb[2].mxu0 }
 0x6db   :  { %v691_v60 = vrot.slane %v684_v58, 2  ;;  %v686_v61 = vpop.f32.mrb[3].mxu0 }
 0x6dc   :  { %v692_v9 = vrot.slane %v686_v61, 2 }
 0x6dd   :  { %v695_v63 = vadd.f32 %v691_v60, %v611_v62 }
 0x6de   :  { %v696_v11 = vadd.f32 %v692_v9, %v612_v17 }
 0x6df   :  { %v697_v0 = vadd.f32 %v695_v63, %v3404_v55 }
 0x6e0   :  { %v698_v12 = vadd.f32 %v696_v11, %v3418_v6 }
 0x6e1   :  { %v2525_v5 = vmul.f32 -1.442695, %v697_v0 }
 0x6e2   :  { %v2526_v23 = vmul.f32 -1.442695, %v698_v12 }
 0x6e3   :  { %2989 = vpow2.f32 %v2525_v5 }
 0x6e4   :  { %2991 = vtanh.f32 %v698_v12 }
 0x6ed   :  { %v2990_v13 = vpop.eup %2989 }
 0x6ee   :  { %v702_v14 = vadd.f32 1.0, %v2990_v13  ;;  %v2992_v15 = vpop.eup %2991 }
 0x6f0   :  { %2993 = vrcp.f32 %v702_v14  ;;  %v857_v14 = vld [vmem:[#allocation2] sm:$0x30] }
 0x6f1   :  { %2995 = vpow2.f32 %v2526_v23 }
 0x6fa   :  { %v2994_v18 = vpop.eup %2993 }
 0x6fb   :  { %v716_v19 = vmul.f32 %v2994_v18, %v2992_v15  ;;  %v715_v21 = vmul.f32 %v2994_v18, %v713_v16  ;;  %v2996_v24 = vpop.eup %2995  ;;  %v861_v15 = vrot.slane %v857_v14, 2  ;;  %v855_v16 = vld [vmem:[#allocation2 + $0x10] sm:$0xc] }
 0x6fc   :  { %v709_v25 = vadd.f32 1.0, %v2996_v24 }
 0x6fd   :  { %718 = vrot.lane.b32.xlu0 %v716_v19, %s3198_s3 }
 0x6fe   :  { %2997 = vrcp.f32 %v709_v25 }
 0x708   :  { %v2998_v29 = vpop.eup %2997 }
 0x76f   :  { %v719_v26 = vpop.permute.xlu0 %718 }
 0x770   :  { %v721_v27 = vadd.f32 %v719_v26, %v715_v21  ;;  %v865_v21 = vsel %vm3398_vm1, %v855_v16, %v861_v15 }
 0x772   :  { %2999 = vtanh.f32 %v721_v27  ;;  %v838_v61 = vrot.slane %v721_v27, 6 }
 0x77c   :  { %v3000_v30 = vpop.eup %2999 }
 0x77d   :  { %v3484_v32 = vmul.f32 %v3000_v30, %v2998_v29 }
 0x77f   :  { %v744_v33 = vrot.slane %v3484_v32, 6 }
 0x781   :  { %745 = vrot.lane.b32.xlu1 %v744_v33, %s3198_s3 }
 0x7f3   :  { %v746_v34 = vpop.permute.xlu1 %745 }
 0x7f4   :  { %2527 = vmatmul.mubr.msk.f32.vlgmr.msra.gmra.mrb[8].mxu1 %vm233_vm5, %v746_v34 }
 0x7f5   :  { %2742 = vmatpush1.bf16.msra.mxu1 %v3307_v20  ;;  %1062 = vmatprep.mubr.f32.mxu1 %v3197_v1 }
 0x7f6   :  { %2744 = vmatprep.subr.bf16.mxu1 %v3312_v22 }
 0x7f9   :  { %2746 = vmatpush1.bf16.msra.mxu1 %v3333_v28 }
 0x7fa   :  { %2748 = vmatprep.subr.bf16.mxu1 %v3342_v31 }
 0x7fd   :  { %2750 = vmatpush1.bf16.msra.mxu1 %v3357_v35 }
 0x7fe   :  { %2752 = vmatprep.subr.bf16.mxu1 %v3367_v38 }
 0x801   :  { %2754 = vmatpush1.bf16.msra.mxu1 %v3373_v39 }
 0x8c7   :  { %v815_v42 = vpop.f32.mrb[8].mxu1 }
 0x8c8   :  { %v820_v43 = vadd.f32 %v815_v42, %v742_v41  ;;  %v817_v44 = vpop.f32.mrb[9].mxu1 }
 0x8c9   :  { %v821_v56 = vadd.f32 %v817_v44, %v743_v54  ;;  %v983_v54 = vld [vmem:[#allocation2] sm:$0xc] }
 0x8ca   :  { %v822_v45 = vadd.f32 %v820_v43, %v3404_v55 }
 0x8cb   :  { %v823_v57 = vadd.f32 %v821_v56, %v3418_v6  ;;  %v987_v56 = vrot.slane %v983_v54, 6 }
 0x8cc   :  { %v2528_v47 = vmul.f32 -1.442695, %v822_v45 }
 0x8cd   :  { %v2529_v4 = vmul.f32 -1.442695, %v823_v57 }
 0x8ce   :  { %3001 = vpow2.f32 %v2528_v47 }
 0x8cf   :  { %3003 = vtanh.f32 %v823_v57  ;;  %v981_v57 = vld [vmem:[#allocation2 + $0x10] sm:$0x30] }
 0x8d8   :  { %v3002_v58 = vpop.eup %3001 }
 0x8d9   :  { %v827_v59 = vadd.f32 1.0, %v3002_v58  ;;  %v3004_v60 = vpop.eup %3003 }
 0x8db   :  { %3005 = vrcp.f32 %v827_v59 }
 0x8dc   :  { %3007 = vpow2.f32 %v2529_v4  ;;  %v984_v4 = vld [vmem:[#allocation2 + $0x8] sm:$0xc] }
 0x8e5   :  { %v3006_v62 = vpop.eup %3005 }
 0x8e6   :  { %v841_v63 = vmul.f32 %v3006_v62, %v3004_v60  ;;  %v840_v0 = vmul.f32 %v3006_v62, %v838_v61  ;;  %v3008_v5 = vpop.eup %3007  ;;  %v991_v61 = vsel %vm3398_vm1, %v981_v57, %v987_v56 }
 0x8e7   :  { %v834_v8 = vadd.f32 1.0, %v3008_v5  ;;  %v982_v5 = vld [vmem:[#allocation2 + $0x18] sm:$0x30] }
 0x8e8   :  { %843 = vrot.lane.b32.xlu0 %v841_v63, %s3198_s3 }
 0x8e9   :  { %3009 = vrcp.f32 %v834_v8 }
 0x8f3   :  { %v3010_v17 = vpop.eup %3009 }
 0x95a   :  { %v844_v9 = vpop.permute.xlu0 %843 }
 0x95b   :  { %v846_v10 = vadd.f32 %v844_v9, %v840_v0  ;;  %v988_v9 = vrot.slane %v984_v4, 6  ;;  %v1274_v4 = vld [vmem:[%s3999_s4 + $0x28] sm:$0xff] }
 0x95d   :  { %3011 = vtanh.f32 %v846_v10  ;;  %v964_v33 = vrot.slane %v846_v10, 6  ;;  %v992_v10 = vsel %vm3409_vm2, %v982_v5, %v988_v9  ;;  %v1276_v5 = vld [vmem:[%s3999_s4 + $0x38] sm:$0xff] }
 0x95e   :  { %v2775_v9 = vpack.c.bf16 %v1276_v5, %v1274_v4 }
 0x967   :  { %v3012_v11 = vpop.eup %3011 }
 0x968   :  { %v848_v12 = vmul.f32 %v3012_v11, %v3010_v17 }
 0x96a   :  { %850 = vrot.lane.b32.xlu1 %v848_v12, %s3198_s3 }
 0x9dc   :  { %v3505_v13 = vpop.permute.xlu1 %850 }
 0x9dd   :  { %2530 = vmatmul.mubr.msk.f32.vlgmr.msra.gmra.mrb[4].mxu0 %vm233_vm5, %v3505_v13 }
 0x9de   :  { %2758 = vmatpush1.bf16.msra.mxu0 %v3307_v20  ;;  %1191 = vmatprep.mubr.f32.mxu0 %v3197_v1 }
 0x9df   :  { %2760 = vmatprep.subr.bf16.mxu0 %v3312_v22 }
 0x9e2   :  { %2762 = vmatpush1.bf16.msra.mxu0 %v3333_v28 }
 0x9e3   :  { %2764 = vmatprep.subr.bf16.mxu0 %v3342_v31  ;;  %v858_v31 = vld [vmem:[#allocation2 + $0x8] sm:$0x30] }
 0x9e6   :  { %2766 = vmatpush1.bf16.msra.mxu0 %v3357_v35  ;;  %v856_v35 = vld [vmem:[#allocation2 + $0x18] sm:$0xc] }
 0x9e7   :  { %2768 = vmatprep.subr.bf16.mxu0 %v3367_v38  ;;  %v862_v38 = vrot.slane %v858_v31, 2 }
 0x9ea   :  { %2770 = vmatpush1.bf16.msra.mxu0 %v3373_v39  ;;  %v866_v39 = vsel %vm3409_vm2, %v856_v35, %v862_v38 }
 0xab0   :  { %v935_v18 = vpop.f32.mrb[4].mxu0 }
 0xab1   :  { %v942_v19 = vrot.slane %v935_v18, 6  ;;  %v937_v20 = vpop.f32.mrb[5].mxu0 }
 0xab2   :  { %v943_v24 = vrot.slane %v937_v20, 6 }
 0xab3   :  { %v946_v22 = vadd.f32 %v942_v19, %v865_v21 }
 0xab4   :  { %v947_v25 = vadd.f32 %v943_v24, %v866_v39 }
 0xab5   :  { %v948_v28 = vadd.f32 %v946_v22, %v3404_v55 }
 0xab6   :  { %v949_v26 = vadd.f32 %v947_v25, %v3418_v6 }
 0xab7   :  { %v2531_v23 = vmul.f32 -1.442695, %v948_v28 }
 0xab8   :  { %v2532_v40 = vmul.f32 -1.442695, %v949_v26 }
 0xab9   :  { %3013 = vpow2.f32 %v2531_v23 }
 0xaba   :  { %3015 = vtanh.f32 %v949_v26 }
 0xac3   :  { %v3014_v27 = vpop.eup %3013 }
 0xac4   :  { %v953_v29 = vadd.f32 1.0, %v3014_v27  ;;  %v3016_v30 = vpop.eup %3015  ;;  %v1112_v27 = vld [vmem:[#allocation2] sm:$0x3] }
 0xac6   :  { %3017 = vrcp.f32 %v953_v29  ;;  %v1116_v29 = vrot.slane %v1112_v27, 2 }
 0xac7   :  { %3019 = vpow2.f32 %v2532_v40 }
 0xad0   :  { %v3018_v34 = vpop.eup %3017 }
 0xad1   :  { %v967_v36 = vmul.f32 %v3018_v34, %v3016_v30  ;;  %v966_v37 = vmul.f32 %v3018_v34, %v964_v33  ;;  %v3020_v41 = vpop.eup %3019  ;;  %v1110_v30 = vld [vmem:[#allocation2 + $0x10] sm:$0xc0] }
 0xad2   :  { %v960_v42 = vadd.f32 1.0, %v3020_v41 }
 0xad3   :  { %969 = vrot.lane.b32.xlu0 %v967_v36, %s3198_s3 }
 0xad4   :  { %3021 = vrcp.f32 %v960_v42  ;;  %v1113_v42 = vld [vmem:[#allocation2 + $0x8] sm:$0x3] }
 0xade   :  { %v3022_v45 = vpop.eup %3021 }
 0xb45   :  { %v970_v43 = vpop.permute.xlu0 %969 }
 0xb46   :  { %v972_v44 = vadd.f32 %v970_v43, %v966_v37  ;;  %v1120_v37 = vsel %vm3398_vm1, %v1110_v30, %v1116_v29  ;;  %v1111_v43 = vld [vmem:[#allocation2 + $0x18] sm:$0xc0] }
 0xb48   :  { %3023 = vtanh.f32 %v972_v44  ;;  %v1093_v16 = vrot.slane %v972_v44, 6 }
 0xb52   :  { %v3024_v47 = vpop.eup %3023 }
 0xb53   :  { %v3524_v49 = vmul.f32 %v3024_v47, %v3022_v45  ;;  %v1117_v45 = vrot.slane %v1113_v42, 2 }
 0xb55   :  { %v993_v50 = vrot.slane %v3524_v49, 2  ;;  %v1121_v47 = vsel %vm3409_vm2, %v1111_v43, %v1117_v45  ;;  %v1252_v45 = vld [vmem:[%s4000_s5 + $0x58] sm:$0xff] }
 0xb57   :  { %994 = vrot.lane.b32.xlu1 %v993_v50, %s3198_s3 }
 0xbc9   :  { %v995_v53 = vpop.permute.xlu1 %994 }
 0xbca   :  { %2533 = vmatmul.mubr.msk.f32.vlgmr.msra.gmra.mrb[10].mxu1 %vm233_vm5, %v995_v53 }
 0xbcb   :  { %1355 = vmatprep.mubr.f32.mxu1 %v3197_v1 }
 0xc9d   :  { %v1064_v58 = vpop.f32.mrb[10].mxu1 }
 0xc9e   :  { %v1071_v59 = vrot.slane %v1064_v58, 4  ;;  %v1066_v60 = vpop.f32.mrb[11].mxu1 }
 0xc9f   :  { %v1072_v8 = vrot.slane %v1066_v60, 4 }
 0xca0   :  { %v1075_v62 = vadd.f32 %v1071_v59, %v991_v61  ;;  %v1270_v61 = vld [vmem:[%s3999_s4 + $0x8] sm:$0xff] }
 0xca1   :  { %v1076_v17 = vadd.f32 %v1072_v8, %v992_v10  ;;  %v1273_v10 = vld [vmem:[%s3999_s4 + $0x20] sm:$0xff] }
 0xca2   :  { %v1077_v63 = vadd.f32 %v1075_v62, %v3404_v55  ;;  %v1272_v62 = vld [vmem:[%s3999_s4 + $0x18] sm:$0xff] }
 0xca3   :  { %v1078_v11 = vadd.f32 %v1076_v17, %v3418_v6  ;;  %v1275_v17 = vld [vmem:[%s3999_s4 + $0x30] sm:$0xff] }
 0xca4   :  { %v2534_v0 = vmul.f32 -1.442695, %v1077_v63  ;;  %v2771_v63 = vpack.c.bf16 %v1272_v62, %v1270_v61 }
 0xca5   :  { %v2535_v21 = vmul.f32 -1.442695, %v1078_v11 }
 0xca6   :  { %3025 = vpow2.f32 %v2534_v0  ;;  %v1271_v0 = vld [vmem:[%s3999_s4 + $0x10] sm:$0xff]  ;;  %2772 = vmatprep.subr.bf16.mxu1 %v2771_v63 }
 0xca7   :  { %3027 = vtanh.f32 %v1078_v11  ;;  %v2777_v11 = vpack.c.bf16 %v1275_v17, %v1273_v10 }
 0xcb0   :  { %v3026_v12 = vpop.eup %3025 }
 0xcb1   :  { %v1082_v14 = vadd.f32 1.0, %v3026_v12  ;;  %v3028_v15 = vpop.eup %3027 }
 0xcb3   :  { %3029 = vrcp.f32 %v1082_v14 }
 0xcb4   :  { %3031 = vpow2.f32 %v2535_v21 }
 0xcbd   :  { %v3030_v18 = vpop.eup %3029 }
 0xcbe   :  { %v1096_v19 = vmul.f32 %v3030_v18, %v3028_v15  ;;  %v1095_v20 = vmul.f32 %v3030_v18, %v1093_v16  ;;  %v3032_v22 = vpop.eup %3031  ;;  %v1278_v18 = vld [vmem:[%s3999_s4 + $0x48] sm:$0xff] }
 0xcbf   :  { %v1089_v28 = vadd.f32 1.0, %v3032_v22  ;;  %v1279_v22 = vld [vmem:[%s3999_s4 + $0x50] sm:$0xff] }
 0xcc0   :  { %1098 = vrot.lane.b32.xlu0 %v1096_v19, %s3198_s3  ;;  %v1280_v19 = vld [vmem:[%s3999_s4 + $0x58] sm:$0xff] }
 0xcc1   :  { %3033 = vrcp.f32 %v1089_v28  ;;  %v2779_v21 = vpack.c.bf16 %v1280_v19, %v1278_v18  ;;  %v1282_v28 = vld [vmem:[%s3999_s4 + $0x68] sm:$0xff] }
 0xccb   :  { %v3034_v35 = vpop.eup %3033 }
 0xd32   :  { %v1099_v23 = vpop.permute.xlu0 %1098 }
 0xd33   :  { %v1101_v31 = vadd.f32 %v1099_v23, %v1095_v20  ;;  %v1284_v23 = vld [vmem:[%s3999_s4 + $0x78] sm:$0xff] }
 0xd35   :  { %3035 = vtanh.f32 %v1101_v31  ;;  %v1222_v58 = vrot.slane %v1101_v31, 6 }
 0xd3f   :  { %v3036_v24 = vpop.eup %3035 }
 0xd40   :  { %v1103_v38 = vmul.f32 %v3036_v24, %v3034_v35  ;;  %v2783_v35 = vpack.c.bf16 %v1284_v23, %v1282_v28  ;;  %v1281_v24 = vld [vmem:[%s3999_s4 + $0x60] sm:$0xff] }
 0xd42   :  { %v1122_v39 = vrot.slane %v1103_v38, 4 }
 0xd44   :  { %1123 = vrot.lane.b32.xlu1 %v1122_v39, %s3198_s3  ;;  %v1242_v39 = vld [vmem:[%s4000_s5 + $0x8] sm:$0xff] }
 0xd48   :  { %463 = vrot.lane.b32.xlu1 %v3442_v7, %s3198_s3 }
 0xd4c   :  { %725 = vrot.lane.b32.xlu1 %v3484_v32, %s3198_s3 }
 0xd50   :  { %1105 = vrot.lane.b32.xlu1 %v1103_v38, %s3198_s3  ;;  %v1283_v38 = vld [vmem:[%s3999_s4 + $0x70] sm:$0xff] }
 0xdb6   :  { %v1124_v25 = vpop.permute.xlu1 %1123 }
 0xdb7   :  { %2536 = vmatmul.mubr.msk.f32.vlgmr.msra.gmra.mrb[6].mxu0 %vm233_vm5, %v1124_v25  ;;  %v1244_v25 = vld [vmem:[%s4000_s5 + $0x18] sm:$0xff] }
 0xdb8   :  { %1448 = vmatprep.mubr.f32.mxu0 %v3197_v1  ;;  %v3628_v27 = vpack.c.bf16 %v1244_v25, %v1242_v39 }
 0xdba   :  { %v464_v26 = vpop.permute.xlu1 %463  ;;  %2788 = vmatprep.subr.bf16.mxu0 %v3628_v27 }
 0xdbb   :  { %467 = vst.msk [vmem:[#allocation3] sm:$0xc] %vm466_vm6, %v464_v26 }
 0xdbc   :  { %469 = vst.msk [vmem:[#allocation3 + $0xa] sm:$0xc] %vm468_vm7, %v464_v26  ;;  %v1241_v26 = vld [vmem:[%s4000_s5] sm:$0xff] }
 0xdbe   :  { %v726_v7 = vpop.permute.xlu1 %725 }
 0xdbf   :  { %729 = vst.msk [vmem:[#allocation3] sm:$0xc0] %vm728_vm8, %v726_v7 }
 0xdc0   :  { %731 = vst.msk [vmem:[#allocation3 + $0x2] sm:$0xc0] %vm730_vm9, %v726_v7  ;;  %v1243_v7 = vld [vmem:[%s4000_s5 + $0x10] sm:$0xff] }
 0xdc1   :  { %853 = vst.msk [vmem:[#allocation3 + $0x8] sm:$0x3] %vm338_vm3, %v3505_v13  ;;  %v3630_v29 = vpack.c.bf16 %v1243_v7, %v1241_v26 }
 0xdc2   :  { %854 = vst.msk [vmem:[#allocation3 + $0x6] sm:$0x3] %vm340_vm4, %v3505_v13  ;;  %v1106_v32 = vpop.permute.xlu1 %1105 }
 0xdc3   :  { %1108 = vst.msk [vmem:[#allocation3 + $0x8] sm:$0x30] %vm597_vm10, %v1106_v32  ;;  %2790 = vmatpush1.bf16.msra.mxu0 %v3630_v29 }
 0xdc4   :  { %1109 = vst.msk [vmem:[#allocation3 - $0x2] sm:$0x30] %vm599_vm11, %v1106_v32  ;;  %v2785_v32 = vpack.c.bf16 %v1283_v38, %v1281_v24 }
 0xe8a   :  { %v1193_v33 = vpop.f32.mrb[6].mxu0 }
 0xe8b   :  { %v1200_v34 = vrot.slane %v1193_v33, 2  ;;  %v1195_v36 = vpop.f32.mrb[7].mxu0  ;;  %v1246_v33 = vld [vmem:[%s4000_s5 + $0x28] sm:$0xff] }
 0xe8c   :  { %v1201_v44 = vrot.slane %v1195_v36, 2 }
 0xe8d   :  { %v1204_v40 = vadd.f32 %v1200_v34, %v1120_v37  ;;  %v1248_v34 = vld [vmem:[%s4000_s5 + $0x38] sm:$0xff] }
 0xe8e   :  { %v1205_v50 = vadd.f32 %v1201_v44, %v1121_v47  ;;  %v3642_v37 = vpack.c.bf16 %v1248_v34, %v1246_v33  ;;  %v1250_v44 = vld [vmem:[%s4000_s5 + $0x48] sm:$0xff]  ;;  %v1249_v47 = vld [vmem:[%s4000_s5 + $0x40] sm:$0xff] }
 0xe8f   :  { %v1206_v41 = vadd.f32 %v1204_v40, %v3404_v55  ;;  %v1245_v40 = vld [vmem:[%s4000_s5 + $0x20] sm:$0xff] }
 0xe90   :  { %v1207_v53 = vadd.f32 %v1205_v50, %v3418_v6  ;;  %v1269_v6 = vld [vmem:[%s3999_s4] sm:$0xff]  ;;  %2792 = vmatprep.subr.bf16.mxu0 %v3642_v37  ;;  %v3665_v50 = vpack.c.bf16 %v1252_v45, %v1250_v44 }
 0xe91   :  { %v2537_v13 = vmul.f32 -1.442695, %v1206_v41  ;;  %v2773_v8 = vpack.c.bf16 %v1271_v0, %v1269_v6  ;;  %v1247_v41 = vld [vmem:[%s4000_s5 + $0x30] sm:$0xff] }
 0xe92   :  { %v2538_v12 = vmul.f32 -1.442695, %v1207_v53  ;;  %v3651_v42 = vpack.c.bf16 %v1247_v41, %v1245_v40 }
 0xe93   :  { %3037 = vpow2.f32 %v2537_v13  ;;  %2774 = vmatpush1.bf16.msra.mxu1 %v2773_v8 }
 0xe94   :  { %3039 = vtanh.f32 %v1207_v53  ;;  %2776 = vmatprep.subr.bf16.mxu1 %v2775_v9  ;;  %2794 = vmatpush1.bf16.msra.mxu0 %v3651_v42  ;;  %v1251_v53 = vld [vmem:[%s4000_s5 + $0x50] sm:$0xff] }
 0xe95   :  { %2796 = vmatprep.subr.bf16.mxu0 %v3665_v50 }
 0xe97   :  { %2778 = vmatpush1.bf16.msra.mxu1 %v2777_v11  ;;  %v1257_v11 = vld [vmem:[%s4001_s6] sm:$0x3] }
 0xe98   :  { %2780 = vmatprep.subr.bf16.mxu1 %v2779_v21  ;;  %v3752_v23 = vrot.slane %v1257_v11, %v117_v48 }
 0xe9d   :  { %v3038_v54 = vpop.eup %3037 }
 0xe9e   :  { %v1211_v56 = vadd.f32 1.0, %v3038_v54  ;;  %v3040_v57 = vpop.eup %3039  ;;  %v1254_v54 = vld [vmem:[%s4000_s5 + $0x68] sm:$0xff] }
 0xea0   :  { %3041 = vrcp.f32 %v1211_v56  ;;  %v1256_v56 = vld [vmem:[%s4000_s5 + $0x78] sm:$0xff] }
 0xea1   :  { %3043 = vpow2.f32 %v2538_v12 }
 0xeaa   :  { %v3042_v59 = vpop.eup %3041 }
 0xeab   :  { %v1225_v55 = vmul.f32 %v3042_v59, %v3040_v57  ;;  %v1224_v60 = vmul.f32 %v3042_v59, %v1222_v58  ;;  %v3676_v57 = vpack.c.bf16 %v1251_v53, %v1249_v47  ;;  %v3678_v58 = vpack.c.bf16 %v1256_v56, %v1254_v54  ;;  %v1253_v59 = vld [vmem:[%s4000_s5 + $0x60] sm:$0xff] }
 0xead   :  { %1227 = vrot.lane.b32.xlu0 %v1225_v55, %s3198_s3  ;;  %v1255_v55 = vld [vmem:[%s4000_s5 + $0x70] sm:$0xff]  ;;  %2798 = vmatpush1.bf16.msra.mxu0 %v3676_v57 }
 0xeae   :  { %2800 = vmatprep.subr.bf16.mxu0 %v3678_v58 }
 0xeb1   :  { %594 = vrot.lane.b32.xlu0 %v3463_v51, %s3198_s3  ;;  %v3044_v51 = vpop.eup %3043 }
 0xeb2   :  { %v1218_v14 = vadd.f32 1.0, %v3044_v51 }
 0xeb4   :  { %3045 = vrcp.f32 %v1218_v14 }
 0xeb5   :  { %976 = vrot.lane.b32.xlu0 %v3524_v49, %s3198_s3  ;;  %v1277_v49 = vld [vmem:[%s3999_s4 + $0x40] sm:$0xff] }
 0xeb6   :  { %v2781_v31 = vpack.c.bf16 %v1279_v22, %v1277_v49 }
 0xeb8   :  { %2782 = vmatpush1.bf16.msra.mxu1 %v2781_v31 }
 0xeb9   :  { %2784 = vmatprep.subr.bf16.mxu1 %v2783_v35 }
 0xebc   :  { %2786 = vmatpush1.bf16.msra.mxu1 %v2785_v32 }
 0xebd   :  { %2804 = vmatprep.subr.bf16.mxu1 %v3628_v27 }
 0xebe   :  { %v3046_v36 = vpop.eup %3045 }
 0xf1f   :  { %v1228_v15 = vpop.permute.xlu0 %1227 }
 0xf20   :  { %v1230_v16 = vadd.f32 %v1228_v15, %v1224_v60  ;;  %v3688_v60 = vpack.c.bf16 %v1255_v55, %v1253_v59  ;;  %v3803_v55 = vrot.slane %v1257_v11, %v121_v3 }
 0xf22   :  { %3047 = vtanh.f32 %v1230_v16  ;;  %2802 = vmatpush1.bf16.msra.mxu0 %v3688_v60 }
 0xf23   :  { %v595_v20 = vpop.permute.xlu0 %594  ;;  %2820 = vmatprep.subr.bf16.mxu0 %v3628_v27 }
 0xf24   :  { %598 = vst.msk [vmem:[#allocation3] sm:$0x30] %vm597_vm10, %v595_v20 }
 0xf25   :  { %600 = vst.msk [vmem:[#allocation3 + $0x6] sm:$0x30] %vm599_vm11, %v595_v20  ;;  %1449 = vmatmul.mubr.f32.vlgmr.msra.gmra.mrb[8].mxu0 %v3197_v1 }
 0xf26   :  { %2822 = vmatpush1.bf16.msra.mxu0 %v3630_v29  ;;  %1686 = vmatprep.mubr.f32.mxu0 %v3197_v1 }
 0xf27   :  { %v977_v30 = vpop.permute.xlu0 %976  ;;  %2824 = vmatprep.subr.bf16.mxu0 %v3642_v37 }
 0xf28   :  { %979 = vst.msk [vmem:[#allocation3 + $0x8] sm:$0xc] %vm466_vm6, %v977_v30 }
 0xf29   :  { %980 = vst.msk [vmem:[#allocation3 + $0x2] sm:$0xc] %vm468_vm7, %v977_v30 }
 0xf2a   :  { %2826 = vmatpush1.bf16.msra.mxu0 %v3651_v42 }
 0xf2b   :  { %2828 = vmatprep.subr.bf16.mxu0 %v3665_v50 }
 0xf2c   :  { %v3048_v13 = vpop.eup %3047 }
 0xf2d   :  { %v1232_v43 = vmul.f32 %v3048_v13, %v3046_v36 }
 0xf2e   :  { %2830 = vmatpush1.bf16.msra.mxu0 %v3676_v57 }
 0xf2f   :  { %1234 = vrot.lane.b32.xlu0 %v1232_v43, %s3198_s3  ;;  %2832 = vmatprep.subr.bf16.mxu0 %v3678_v58 }
 0xf32   :  { %2834 = vmatpush1.bf16.msra.mxu0 %v3688_v60 }
 0xf33   :  { %2852 = vmatprep.subr.bf16.mxu0 %v3628_v27 }
 0xfa1   :  { %v3703_v61 = vpop.permute.xlu0 %1234 }
 0xfa2   :  { %1237 = vst.msk [vmem:[#allocation3 + $0x8] sm:$0xc0] %vm728_vm8, %v3703_v61 }
 0xfa3   :  { %1238 = vst.msk [vmem:[#allocation3 - $0x6] sm:$0xc0] %vm730_vm9, %v3703_v61 }
 0xfa9   :  { %v1240_v6 = vld [vmem:[#allocation3 + $0x8] sm:$0xff] }
 0xfaa   :  { %v1239_v62 = vld [vmem:[#allocation3] sm:$0xff] }
 0xfab   :  { %2539 = vmatmul.mubr.msk.f32.vlgmr.msra.gmra.mrb[12].mxu1 %vm233_vm5, %v1239_v62 }
 0xfac   :  { %1361 = vmatprep.mubr.f32.mxu1 %v3197_v1  ;;  %2806 = vmatpush1.bf16.msra.mxu1 %v3630_v29 }
 0xfad   :  { %2808 = vmatprep.subr.bf16.mxu1 %v3642_v37 }
 0xfaf   :  { %2540 = vmatmul.mubr.msk.f32.gmra.mrb[14].mxu1 %vm233_vm5, %v1240_v6 }
 0xfb0   :  { %2810 = vmatpush1.bf16.msra.mxu1 %v3651_v42  ;;  %1562 = vmatprep.mubr.f32.mxu1 %v3197_v1 }
 0xfb1   :  { %2812 = vmatprep.subr.bf16.mxu1 %v3665_v50 }
 0xfb4   :  { %2814 = vmatpush1.bf16.msra.mxu1 %v3676_v57 }
 0xfb5   :  { %2816 = vmatprep.subr.bf16.mxu1 %v3678_v58 }
 0xfb8   :  { %2818 = vmatpush1.bf16.msra.mxu1 %v3688_v60 }
 0xfb9   :  { %2836 = vmatprep.subr.bf16.mxu1 %v3628_v27 }
 0xff8   :  { %v1450_v63 = vpop.f32.mrb[8].mxu0 }
 0xff9   :  { %v1452_v0 = vpop.f32.mrb[9].mxu0 }
0x107e   :  { %v1357_v4 = vpop.f32.mrb[12].mxu1 }
0x107f   :  { %1368 = vst [vmem:[#allocation2] sm:$0xff] %v1357_v4  ;;  %v1359_v5 = vpop.f32.mrb[13].mxu1 }
0x1080   :  { %1369 = vst [vmem:[#allocation2 + $0x8] sm:$0xff] %v1359_v5 }
0x1082   :  { %v1363_v8 = vpop.f32.mrb[14].mxu1 }
0x1083   :  { %1370 = vst [vmem:[#allocation2 + $0x10] sm:$0xff] %v1363_v8  ;;  %v1365_v9 = vpop.f32.mrb[15].mxu1 }
0x1084   :  { %1371 = vst [vmem:[#allocation2 + $0x18] sm:$0xff] %v1365_v9 }
0x1086   :  { %v3721_v10 = vld [vmem:[#allocation2] sm:$0xc]  ;;  %v3723_v17 = vld [vmem:[#allocation2] sm:$0x30]  ;;  %v1372_v15 = vld [vmem:[#allocation2] sm:$0x3] }
0x1087   :  { %v2087_v12 = vrot.slane %v3721_v10, 6  ;;  %v1968_v51 = vrot.slane %v3723_v17, 2  ;;  %v3730_v14 = vld [vmem:[#allocation2 + $0x8] sm:$0x30]  ;;  %v3736_v20 = vld [vmem:[#allocation2] sm:$0xc0] }
0x1088   :  { %v3738_v21 = vld [vmem:[#allocation2 + $0x8] sm:$0xc0]  ;;  %v1373_v31 = vld [vmem:[#allocation2 + $0x8] sm:$0x3]  ;;  %v3754_v35 = vld [vmem:[#allocation2 + $0x8] sm:$0xc] }
0x1089   :  { %v1969_v24 = vrot.slane %v3730_v14, 2  ;;  %v1854_v48 = vrot.slane %v3736_v20, 6  ;;  %v1855_v33 = vrot.slane %v3738_v21, 6  ;;  %v2207_v34 = vrot.slane %v1372_v15, 2 }
0x108a   :  { %v1374_v16 = vld [vmem:[#allocation2 + $0x10] sm:$0xc0]  ;;  %v3732_v18 = vld [vmem:[#allocation2 + $0x10] sm:$0x30]  ;;  %v3734_v19 = vld [vmem:[#allocation2 + $0x10] sm:$0xc] }
0x108b   :  { %v1378_v49 = vrot.slane %v1374_v16, 6  ;;  %v3743_v22 = vsel %vm3398_vm1, %v3734_v19, %v1968_v51  ;;  %v3748_v28 = vsel %vm3398_vm1, %v3732_v18, %v2087_v12  ;;  %v3759_v39 = vld [vmem:[#allocation2 + $0x18] sm:$0xc]  ;;  %v3761_v25 = vld [vmem:[#allocation2 + $0x10] sm:$0x3]  ;;  %v2208_v36 = vrot.slane %v1373_v31, 2 }
0x108c   :  { %v3763_v26 = vld [vmem:[#allocation2 + $0x18] sm:$0x3]  ;;  %v1375_v32 = vld [vmem:[#allocation2 + $0x18] sm:$0xc0]  ;;  %v3765_v30 = vld [vmem:[#allocation2 + $0x18] sm:$0x30]  ;;  %v3774_v13 = vsel %vm3398_vm1, %v3761_v25, %v1854_v48  ;;  %v3784_v44 = vsel %vm3409_vm2, %v3759_v39, %v1969_v24  ;;  %v3793_v54 = vsel %vm3398_vm1, %v1374_v16, %v2207_v34 }
0x108d   :  { %v1382_v38 = vsel %vm3398_vm1, %v1372_v15, %v1378_v49  ;;  %v2088_v40 = vrot.slane %v3754_v35, 6  ;;  %v3779_v43 = vsel %vm3409_vm2, %v3763_v26, %v1855_v33  ;;  %v1379_v45 = vrot.slane %v1375_v32, 6 }
0x108e   :  { %v1455_v7 = vadd.f32 %v1450_v63, %v1382_v38  ;;  %v3797_v56 = vsel %vm3409_vm2, %v1375_v32, %v2208_v36  ;;  %v1487_v24 = vrot.slane %v3732_v18, 2 }
0x108f   :  { %v3789_v47 = vsel %vm3409_vm2, %v3765_v30, %v2088_v40  ;;  %v1383_v59 = vsel %vm3409_vm2, %v1373_v31, %v1379_v45  ;;  %v1488_v40 = vrot.slane %v3765_v30, 2 }
0x1090   :  { %v1457_v41 = vadd.f32 %v1455_v7, %v3752_v23  ;;  %v1456_v62 = vadd.f32 %v1452_v0, %v1383_v59  ;;  %v1491_v48 = vsel %vm3398_vm1, %v3721_v10, %v1487_v24 }
0x1091   :  { %v1492_v45 = vsel %vm3409_vm2, %v3754_v35, %v1488_v40 }
0x1092   :  { %v2541_v53 = vmul.f32 -1.442695, %v1457_v41  ;;  %v1458_v6 = vadd.f32 %v1456_v62, %v3803_v55 }
0x1094   :  { %3049 = vpow2.f32 %v2541_v53  ;;  %v2542_v12 = vmul.f32 -1.442695, %v1458_v6 }
0x1095   :  { %3051 = vtanh.f32 %v1458_v6 }
0x109e   :  { %v3050_v63 = vpop.eup %3049 }
0x109f   :  { %v1462_v4 = vadd.f32 1.0, %v3050_v63  ;;  %v3052_v5 = vpop.eup %3051 }
0x10a1   :  { %3053 = vrcp.f32 %v1462_v4 }
0x10a2   :  { %3055 = vpow2.f32 %v2542_v12 }
0x10ab   :  { %v3054_v8 = vpop.eup %3053 }
0x10ac   :  { %v1473_v9 = vmul.f32 %v3054_v8, %v3052_v5  ;;  %v3056_v51 = vpop.eup %3055  ;;  %v1472_v16 = vmul.f32 0.0, %v3054_v8 }
0x10ad   :  { %v1469_v15 = vadd.f32 1.0, %v3056_v51 }
0x10ae   :  { %1475 = vrot.lane.b32.xlu1 %v1473_v9, %s3198_s3 }
0x10af   :  { %3057 = vrcp.f32 %v1469_v15 }
0x10b9   :  { %v3058_v0 = vpop.eup %3057 }
0x1120   :  { %v1476_v46 = vpop.permute.xlu1 %1475 }
0x1121   :  { %v1478_v3 = vadd.f32 %v1476_v46, %v1472_v16 }
0x1123   :  { %3059 = vtanh.f32 %v1478_v3  ;;  %v1593_v6 = vrot.slane %v1478_v3, 6 }
0x112d   :  { %v3060_v11 = vpop.eup %3059 }
0x112e   :  { %v1480_v49 = vmul.f32 %v3060_v11, %v3058_v0  ;;  %v1610_v0 = vrot.slane %v3734_v19, 6 }
0x1130   :  { %1494 = vrot.lane.b32.xlu0 %v1480_v49, %s3198_s3  ;;  %v1614_v24 = vsel %vm3398_vm1, %v3723_v17, %v1610_v0  ;;  %v1735_v0 = vrot.slane %v3763_v26, 2 }
0x11a2   :  { %v1495_v31 = vpop.permute.xlu0 %1494 }
0x11a3   :  { %2543 = vmatmul.mubr.msk.f32.vlgmr.msra.gmra.mrb[16].mxu1 %vm233_vm5, %v1495_v31 }
0x11a4   :  { %2838 = vmatpush1.bf16.msra.mxu1 %v3630_v29  ;;  %1810 = vmatprep.mubr.f32.mxu1 %v3197_v1 }
0x11a5   :  { %2840 = vmatprep.subr.bf16.mxu1 %v3642_v37 }
0x11a8   :  { %2842 = vmatpush1.bf16.msra.mxu1 %v3651_v42 }
0x11a9   :  { %2844 = vmatprep.subr.bf16.mxu1 %v3665_v50 }
0x11ac   :  { %2846 = vmatpush1.bf16.msra.mxu1 %v3676_v57 }
0x11ad   :  { %2848 = vmatprep.subr.bf16.mxu1 %v3678_v58 }
0x11b0   :  { %2850 = vmatpush1.bf16.msra.mxu1 %v3688_v60 }
0x11b1   :  { %2868 = vmatprep.subr.bf16.mxu1 %v3628_v27 }
0x1276   :  { %v1564_v38 = vpop.f32.mrb[16].mxu1 }
0x1277   :  { %v1571_v7 = vrot.slane %v1564_v38, 6  ;;  %v1566_v32 = vpop.f32.mrb[17].mxu1 }
0x1278   :  { %v1572_v41 = vrot.slane %v1566_v32, 6 }
0x1279   :  { %v1575_v33 = vadd.f32 %v1571_v7, %v1491_v48  ;;  %v1611_v48 = vrot.slane %v3759_v39, 6 }
0x127a   :  { %v1576_v18 = vadd.f32 %v1572_v41, %v1492_v45 }
0x127b   :  { %v1577_v34 = vadd.f32 %v1575_v33, %v3752_v23 }
0x127c   :  { %v1578_v53 = vadd.f32 %v1576_v18, %v3803_v55 }
0x127d   :  { %v2544_v36 = vmul.f32 -1.442695, %v1577_v34  ;;  %v1615_v34 = vsel %vm3409_vm2, %v3730_v14, %v1611_v48 }
0x127e   :  { %v2545_v30 = vmul.f32 -1.442695, %v1578_v53 }
0x127f   :  { %3061 = vpow2.f32 %v2544_v36 }
0x1280   :  { %3063 = vtanh.f32 %v1578_v53 }
0x1289   :  { %v3062_v59 = vpop.eup %3061 }
0x128a   :  { %v1582_v62 = vadd.f32 1.0, %v3062_v59  ;;  %v3064_v10 = vpop.eup %3063 }
0x128c   :  { %3065 = vrcp.f32 %v1582_v62 }
0x128d   :  { %3067 = vpow2.f32 %v2545_v30 }
0x1296   :  { %v3066_v63 = vpop.eup %3065 }
0x1297   :  { %v1596_v4 = vmul.f32 %v3066_v63, %v3064_v10  ;;  %v1595_v5 = vmul.f32 %v3066_v63, %v1593_v6  ;;  %v3068_v8 = vpop.eup %3067 }
0x1298   :  { %v1589_v9 = vadd.f32 1.0, %v3068_v8 }
0x1299   :  { %1598 = vrot.lane.b32.xlu1 %v1596_v4, %s3198_s3 }
0x129a   :  { %3069 = vrcp.f32 %v1589_v9  ;;  %v1734_v9 = vrot.slane %v3761_v25, 2 }
0x12a4   :  { %v3070_v51 = vpop.eup %3069 }
0x130b   :  { %v1599_v12 = vpop.permute.xlu1 %1598 }
0x130c   :  { %v1601_v35 = vadd.f32 %v1599_v12, %v1595_v5 }
0x130e   :  { %3071 = vtanh.f32 %v1601_v35  ;;  %v1717_v45 = vrot.slane %v1601_v35, 6 }
0x1318   :  { %v3072_v15 = vpop.eup %3071 }
0x1319   :  { %v1603_v16 = vmul.f32 %v3072_v15, %v3070_v51  ;;  %v1738_v15 = vsel %vm3398_vm1, %v3736_v20, %v1734_v9 }
0x131b   :  { %v1617_v46 = vrot.slane %v1603_v16, 2 }
0x131d   :  { %1618 = vrot.lane.b32.xlu0 %v1617_v46, %s3198_s3 }
0x138f   :  { %v1619_v3 = vpop.permute.xlu0 %1618 }
0x1390   :  { %2546 = vmatmul.mubr.msk.f32.vlgmr.msra.gmra.mrb[10].mxu0 %vm233_vm5, %v1619_v3 }
0x1391   :  { %2854 = vmatpush1.bf16.msra.mxu0 %v3630_v29  ;;  %1930 = vmatprep.mubr.f32.mxu0 %v3197_v1 }
0x1392   :  { %2856 = vmatprep.subr.bf16.mxu0 %v3642_v37 }
0x1395   :  { %2858 = vmatpush1.bf16.msra.mxu0 %v3651_v42 }
0x1396   :  { %2860 = vmatprep.subr.bf16.mxu0 %v3665_v50 }
0x1399   :  { %2862 = vmatpush1.bf16.msra.mxu0 %v3676_v57 }
0x139a   :  { %2864 = vmatprep.subr.bf16.mxu0 %v3678_v58 }
0x139d   :  { %2866 = vmatpush1.bf16.msra.mxu0 %v3688_v60 }
0x139e   :  { %2884 = vmatprep.subr.bf16.mxu0 %v3628_v27 }
0x1463   :  { %v1688_v11 = vpop.f32.mrb[10].mxu0 }
0x1464   :  { %v1695_v49 = vrot.slane %v1688_v11, 4  ;;  %v1690_v31 = vpop.f32.mrb[11].mxu0 }
0x1465   :  { %v1696_v33 = vrot.slane %v1690_v31, 4 }
0x1466   :  { %v1699_v38 = vadd.f32 %v1695_v49, %v1614_v24 }
0x1467   :  { %v1700_v19 = vadd.f32 %v1696_v33, %v1615_v34 }
0x1468   :  { %v1701_v7 = vadd.f32 %v1699_v38, %v3752_v23 }
0x1469   :  { %v1702_v36 = vadd.f32 %v1700_v19, %v3803_v55 }
0x146a   :  { %v2547_v32 = vmul.f32 -1.442695, %v1701_v7 }
0x146b   :  { %v2548_v39 = vmul.f32 -1.442695, %v1702_v36 }
0x146c   :  { %3073 = vpow2.f32 %v2547_v32 }
0x146d   :  { %3075 = vtanh.f32 %v1702_v36 }
0x1476   :  { %v3074_v40 = vpop.eup %3073 }
0x1477   :  { %v1706_v41 = vadd.f32 1.0, %v3074_v40  ;;  %v3076_v17 = vpop.eup %3075 }
0x1479   :  { %3077 = vrcp.f32 %v1706_v41 }
0x147a   :  { %3079 = vpow2.f32 %v2548_v39 }
0x1483   :  { %v3078_v18 = vpop.eup %3077 }
0x1484   :  { %v1720_v53 = vmul.f32 %v3078_v18, %v3076_v17  ;;  %v1719_v59 = vmul.f32 %v3078_v18, %v1717_v45  ;;  %v3080_v62 = vpop.eup %3079 }
0x1485   :  { %v1713_v10 = vadd.f32 1.0, %v3080_v62 }
0x1486   :  { %1722 = vrot.lane.b32.xlu1 %v1720_v53, %s3198_s3 }
0x1487   :  { %3081 = vrcp.f32 %v1713_v10 }
0x1491   :  { %v3082_v63 = vpop.eup %3081 }
0x14f8   :  { %v1723_v6 = vpop.permute.xlu1 %1722 }
0x14f9   :  { %v1725_v14 = vadd.f32 %v1723_v6, %v1719_v59 }
0x14fb   :  { %3083 = vtanh.f32 %v1725_v14  ;;  %v1841_v20 = vrot.slane %v1725_v14, 6 }
0x1505   :  { %v3084_v4 = vpop.eup %3083 }
0x1506   :  { %v1727_v5 = vmul.f32 %v3084_v4, %v3082_v63 }
0x1508   :  { %v1741_v30 = vrot.slane %v1727_v5, 4 }
0x150a   :  { %1742 = vrot.lane.b32.xlu0 %v1741_v30, %s3198_s3 }
0x157c   :  { %v1743_v8 = vpop.permute.xlu0 %1742 }
0x157d   :  { %2549 = vmatmul.mubr.msk.f32.vlgmr.msra.gmra.mrb[18].mxu1 %vm233_vm5, %v1743_v8 }
0x157e   :  { %2870 = vmatpush1.bf16.msra.mxu1 %v3630_v29  ;;  %2043 = vmatprep.mubr.f32.mxu1 %v3197_v1 }
0x157f   :  { %2872 = vmatprep.subr.bf16.mxu1 %v3642_v37 }
0x1582   :  { %2874 = vmatpush1.bf16.msra.mxu1 %v3651_v42 }
0x1583   :  { %2876 = vmatprep.subr.bf16.mxu1 %v3665_v50 }
0x1586   :  { %2878 = vmatpush1.bf16.msra.mxu1 %v3676_v57 }
0x1587   :  { %2880 = vmatprep.subr.bf16.mxu1 %v3678_v58 }
0x158a   :  { %2882 = vmatpush1.bf16.msra.mxu1 %v3688_v60 }
0x158b   :  { %2900 = vmatprep.subr.bf16.mxu1 %v3628_v27  ;;  %v1739_v27 = vsel %vm3409_vm2, %v3738_v21, %v1735_v0 }
0x1650   :  { %v1812_v12 = vpop.f32.mrb[18].mxu1 }
0x1651   :  { %v1819_v35 = vrot.slane %v1812_v12, 2  ;;  %v1814_v51 = vpop.f32.mrb[19].mxu1 }
0x1652   :  { %v1820_v11 = vrot.slane %v1814_v51, 2 }
0x1653   :  { %v1823_v16 = vadd.f32 %v1819_v35, %v1738_v15 }
0x1654   :  { %v1824_v25 = vadd.f32 %v1820_v11, %v1739_v27 }
0x1655   :  { %v1825_v46 = vadd.f32 %v1823_v16, %v3752_v23 }
0x1656   :  { %v1826_v49 = vadd.f32 %v1824_v25, %v3803_v55 }
0x1657   :  { %v2550_v3 = vmul.f32 -1.442695, %v1825_v46 }
0x1658   :  { %v2551_v26 = vmul.f32 -1.442695, %v1826_v49 }
0x1659   :  { %3085 = vpow2.f32 %v2550_v3 }
0x165a   :  { %3087 = vtanh.f32 %v1826_v49 }
0x1663   :  { %v3086_v31 = vpop.eup %3085 }
0x1664   :  { %v1830_v24 = vadd.f32 1.0, %v3086_v31  ;;  %v3088_v52 = vpop.eup %3087 }
0x1666   :  { %3089 = vrcp.f32 %v1830_v24 }
0x1667   :  { %3091 = vpow2.f32 %v2551_v26 }
0x1670   :  { %v3090_v38 = vpop.eup %3089 }
0x1671   :  { %v1844_v7 = vmul.f32 %v3090_v38, %v3088_v52  ;;  %v1843_v32 = vmul.f32 %v3090_v38, %v1841_v20  ;;  %v3092_v48 = vpop.eup %3091 }
0x1672   :  { %v1837_v33 = vadd.f32 1.0, %v3092_v48 }
0x1673   :  { %1846 = vrot.lane.b32.xlu1 %v1844_v7, %s3198_s3 }
0x1674   :  { %3093 = vrcp.f32 %v1837_v33 }
0x167e   :  { %v3094_v34 = vpop.eup %3093 }
0x16e5   :  { %v1847_v2 = vpop.permute.xlu1 %1846 }
0x16e6   :  { %v1849_v21 = vadd.f32 %v1847_v2, %v1843_v32 }
0x16e8   :  { %3095 = vtanh.f32 %v1849_v21  ;;  %v1955_v63 = vrot.slane %v1849_v21, 6 }
0x16f2   :  { %v3096_v19 = vpop.eup %3095 }
0x16f3   :  { %v1851_v36 = vmul.f32 %v3096_v19, %v3094_v34 }
0x16f5   :  { %v1861_v40 = vrot.slane %v1851_v36, 6 }
0x16f7   :  { %1862 = vrot.lane.b32.xlu0 %v1861_v40, %s3198_s3 }
0x1769   :  { %v1863_v41 = vpop.permute.xlu0 %1862 }
0x176a   :  { %2552 = vmatmul.mubr.msk.f32.vlgmr.msra.gmra.mrb[12].mxu0 %vm233_vm5, %v1863_v41 }
0x176b   :  { %2886 = vmatpush1.bf16.msra.mxu0 %v3630_v29  ;;  %2163 = vmatprep.mubr.f32.mxu0 %v3197_v1 }
0x176c   :  { %2888 = vmatprep.subr.bf16.mxu0 %v3642_v37 }
0x176f   :  { %2890 = vmatpush1.bf16.msra.mxu0 %v3651_v42 }
0x1770   :  { %2892 = vmatprep.subr.bf16.mxu0 %v3665_v50 }
0x1773   :  { %2894 = vmatpush1.bf16.msra.mxu0 %v3676_v57 }
0x1774   :  { %2896 = vmatprep.subr.bf16.mxu0 %v3678_v58 }
0x1777   :  { %2898 = vmatpush1.bf16.msra.mxu0 %v3688_v60 }
0x183d   :  { %v1932_v17 = vpop.f32.mrb[12].mxu0 }
0x183e   :  { %v1937_v45 = vadd.f32 %v1932_v17, %v3774_v13  ;;  %v1934_v18 = vpop.f32.mrb[13].mxu0 }
0x183f   :  { %v1938_v53 = vadd.f32 %v1934_v18, %v3779_v43 }
0x1840   :  { %v1939_v59 = vadd.f32 %v1937_v45, %v3752_v23 }
0x1841   :  { %v1940_v62 = vadd.f32 %v1938_v53, %v3803_v55 }
0x1842   :  { %v2553_v39 = vmul.f32 -1.442695, %v1939_v59 }
0x1843   :  { %v2554_v13 = vmul.f32 -1.442695, %v1940_v62 }
0x1844   :  { %3097 = vpow2.f32 %v2553_v39 }
0x1845   :  { %3099 = vtanh.f32 %v1940_v62 }
0x184e   :  { %v3098_v10 = vpop.eup %3097 }
0x184f   :  { %v1944_v6 = vadd.f32 1.0, %v3098_v10  ;;  %v3100_v14 = vpop.eup %3099 }
0x1851   :  { %3101 = vrcp.f32 %v1944_v6 }
0x1852   :  { %3103 = vpow2.f32 %v2554_v13 }
0x185b   :  { %v3102_v4 = vpop.eup %3101 }
0x185c   :  { %v1958_v5 = vmul.f32 %v3102_v4, %v3100_v14  ;;  %v1957_v30 = vmul.f32 %v3102_v4, %v1955_v63  ;;  %v3104_v43 = vpop.eup %3103 }
0x185d   :  { %v1951_v8 = vadd.f32 1.0, %v3104_v43 }
0x185e   :  { %1960 = vrot.lane.b32.xlu1 %v1958_v5, %s3198_s3 }
0x185f   :  { %3105 = vrcp.f32 %v1951_v8 }
0x1869   :  { %v3106_v35 = vpop.eup %3105 }
0x18d0   :  { %v1961_v9 = vpop.permute.xlu1 %1960 }
0x18d1   :  { %v1963_v12 = vadd.f32 %v1961_v9, %v1957_v30  ;;  %v2326_v9 = vld [vmem:[%s4002_s7] sm:$0xff] }
0x18d3   :  { %3107 = vtanh.f32 %v1963_v12 }
0x18dd   :  { %v3108_v51 = vpop.eup %3107 }
0x18de   :  { %v1965_v15 = vmul.f32 %v3108_v51, %v3106_v35  ;;  %v2328_v35 = vld [vmem:[%s4002_s7 + $0x10] sm:$0xff]  ;;  %v3199_v51 = vmov 0.0|0.0  }
0x18df   :  { %2915 = vmatprep.subr.bf16.mxu0 %v3199_v51 }
0x18e0   :  { %1975 = vrot.lane.b32.xlu0 %v1965_v15, %s3198_s3 }
0x1952   :  { %v1976_v16 = vpop.permute.xlu0 %1975 }
0x1953   :  { %2555 = vmatmul.mubr.msk.f32.vlgmr.msra.gmra.mrb[20].mxu1 %vm233_vm5, %v1976_v16  ;;  %v2329_v16 = vld [vmem:[%s4002_s7 + $0x18] sm:$0xff] }
0x1954   :  { %2902 = vmatpush1.bf16.msra.mxu1 %v3630_v29  ;;  %2283 = vmatprep.mubr.f32.mxu1 %v3197_v1 }
0x1955   :  { %2904 = vmatprep.subr.bf16.mxu1 %v3642_v37 }
0x1958   :  { %2906 = vmatpush1.bf16.msra.mxu1 %v3651_v42 }
0x1959   :  { %2908 = vmatprep.subr.bf16.mxu1 %v3665_v50 }
0x195c   :  { %2910 = vmatpush1.bf16.msra.mxu1 %v3676_v57 }
0x195d   :  { %2912 = vmatprep.subr.bf16.mxu1 %v3678_v58 }
0x1960   :  { %2914 = vmatpush1.bf16.msra.mxu1 %v3688_v60  ;;  %v2074_v60 = vrot.slane %v1963_v12, 6  ;;  %v2327_v12 = vld [vmem:[%s4002_s7 + $0x8] sm:$0xff] }
0x1961   :  { %v2916_v15 = vpack.c.bf16 %v2327_v12, %v2326_v9  ;;  %2939 = vmatprep.subr.bf16.mxu1 %v3199_v51 }
0x1a26   :  { %v2045_v46 = vpop.f32.mrb[20].mxu1 }
0x1a27   :  { %v2052_v3 = vrot.slane %v2045_v46, 6  ;;  %v2047_v0 = vpop.f32.mrb[21].mxu1  ;;  %v2919_v46 = vpack.c.bf16 %v2329_v16, %v2328_v35 }
0x1a28   :  { %v2053_v11 = vrot.slane %v2047_v0, 6  ;;  %v2331_v0 = vld [vmem:[%s4002_s7 + $0x28] sm:$0xff] }
0x1a29   :  { %v2056_v29 = vadd.f32 %v2052_v3, %v3743_v22  ;;  %v2330_v3 = vld [vmem:[%s4002_s7 + $0x20] sm:$0xff] }
0x1a2a   :  { %v2057_v27 = vadd.f32 %v2053_v11, %v3784_v44  ;;  %v2922_v11 = vpack.c.bf16 %v2331_v0, %v2330_v3 }
0x1a2b   :  { %v2058_v37 = vadd.f32 %v2056_v29, %v3752_v23  ;;  %v2332_v29 = vld [vmem:[%s4002_s7 + $0x30] sm:$0xff] }
0x1a2c   :  { %v2059_v42 = vadd.f32 %v2057_v27, %v3803_v55  ;;  %v2333_v27 = vld [vmem:[%s4002_s7 + $0x38] sm:$0xff] }
0x1a2d   :  { %v2556_v25 = vmul.f32 -1.442695, %v2058_v37  ;;  %v2925_v37 = vpack.c.bf16 %v2333_v27, %v2332_v29 }
0x1a2e   :  { %v2557_v22 = vmul.f32 -1.442695, %v2059_v42 }
0x1a2f   :  { %3109 = vpow2.f32 %v2556_v25 }
0x1a30   :  { %3111 = vtanh.f32 %v2059_v42 }
0x1a39   :  { %v3110_v50 = vpop.eup %3109 }
0x1a3a   :  { %v2063_v57 = vadd.f32 1.0, %v3110_v50  ;;  %v3112_v58 = vpop.eup %3111 }
0x1a3c   :  { %3113 = vrcp.f32 %v2063_v57 }
0x1a3d   :  { %3115 = vpow2.f32 %v2557_v22 }
0x1a46   :  { %v3114_v49 = vpop.eup %3113 }
0x1a47   :  { %v2077_v31 = vmul.f32 %v3114_v49, %v3112_v58  ;;  %v2076_v24 = vmul.f32 %v3114_v49, %v2074_v60  ;;  %v3116_v44 = vpop.eup %3115 }
0x1a48   :  { %v2070_v52 = vadd.f32 1.0, %v3116_v44 }
0x1a49   :  { %2079 = vrot.lane.b32.xlu1 %v2077_v31, %s3198_s3 }
0x1a4a   :  { %3117 = vrcp.f32 %v2070_v52 }
0x1a54   :  { %v3118_v7 = vpop.eup %3117 }
0x1abb   :  { %v2080_v20 = vpop.permute.xlu1 %2079 }
0x1abc   :  { %v2082_v38 = vadd.f32 %v2080_v20, %v2076_v24 }
0x1abe   :  { %3119 = vtanh.f32 %v2082_v38  ;;  %v2194_v39 = vrot.slane %v2082_v38, 6 }
0x1ac8   :  { %v3120_v32 = vpop.eup %3119 }
0x1ac9   :  { %v2084_v26 = vmul.f32 %v3120_v32, %v3118_v7 }
0x1acb   :  { %v2094_v48 = vrot.slane %v2084_v26, 2  ;;  %v2337_v26 = vld [vmem:[%s4002_s7 + $0x58] sm:$0xff] }
0x1acd   :  { %2095 = vrot.lane.b32.xlu0 %v2094_v48, %s3198_s3 }
0x1b3f   :  { %v2096_v33 = vpop.permute.xlu0 %2095 }
0x1b40   :  { %2558 = vmatmul.mubr.msk.f32.vlgmr.msra.gmra.mrb[14].mxu0 %vm233_vm5, %v2096_v33  ;;  %v2338_v33 = vld [vmem:[%s4002_s7 + $0x60] sm:$0xff] }
0x1b41   :  { %2917 = vmatpush3.bf16.msra.mxu0 %v2916_v15  ;;  %2621 = vmatprep.mubr.msk.f32.mxu0 %vm3200_vm12, %v3197_v1 }
0x1b42   :  { %2918 = vmatprep.subr.bf16.mxu0 %v3199_v51 }
0x1b45   :  { %2920 = vmatpush3.bf16.msra.mxu0 %v2919_v46 }
0x1b46   :  { %2921 = vmatprep.subr.bf16.mxu0 %v3199_v51 }
0x1b49   :  { %2923 = vmatpush3.bf16.msra.mxu0 %v2922_v11 }
0x1b4a   :  { %2924 = vmatprep.subr.bf16.mxu0 %v3199_v51 }
0x1b4d   :  { %2926 = vmatpush3.bf16.msra.mxu0 %v2925_v37 }
0x1b4e   :  { %2927 = vmatprep.subr.bf16.mxu0 %v3199_v51 }
0x1c13   :  { %v2165_v2 = vpop.f32.mrb[14].mxu0 }
0x1c14   :  { %v2172_v21 = vrot.slane %v2165_v2, 4  ;;  %v2167_v34 = vpop.f32.mrb[15].mxu0  ;;  %v2339_v2 = vld [vmem:[%s4002_s7 + $0x68] sm:$0xff] }
0x1c15   :  { %v2173_v19 = vrot.slane %v2167_v34, 4 }
0x1c16   :  { %v2176_v36 = vadd.f32 %v2172_v21, %v3748_v28  ;;  %v2422_v21 = vld [vmem:[%s4004_s9] sm:$0xff] }
0x1c17   :  { %v2177_v40 = vadd.f32 %v2173_v19, %v3789_v47  ;;  %v2934_v19 = vpack.c.bf16 %v2339_v2, %v2338_v33 }
0x1c18   :  { %v2178_v41 = vadd.f32 %v2176_v36, %v3752_v23  ;;  %v2340_v36 = vld [vmem:[%s4002_s7 + $0x70] sm:$0xff] }
0x1c19   :  { %v2179_v45 = vadd.f32 %v2177_v40, %v3803_v55  ;;  %v2341_v40 = vld [vmem:[%s4002_s7 + $0x78] sm:$0xff] }
0x1c1a   :  { %v2559_v17 = vmul.f32 -1.442695, %v2178_v41  ;;  %v2937_v41 = vpack.c.bf16 %v2341_v40, %v2340_v36 }
0x1c1b   :  { %v2560_v28 = vmul.f32 -1.442695, %v2179_v45 }
0x1c1c   :  { %3121 = vpow2.f32 %v2559_v17 }
0x1c1d   :  { %3123 = vtanh.f32 %v2179_v45 }
0x1c26   :  { %v3122_v18 = vpop.eup %3121 }
0x1c27   :  { %v2183_v53 = vadd.f32 1.0, %v3122_v18  ;;  %v3124_v59 = vpop.eup %3123 }
0x1c29   :  { %3125 = vrcp.f32 %v2183_v53 }
0x1c2a   :  { %3127 = vpow2.f32 %v2560_v28 }
0x1c33   :  { %v3126_v62 = vpop.eup %3125 }
0x1c34   :  { %v2197_v10 = vmul.f32 %v3126_v62, %v3124_v59  ;;  %v2196_v6 = vmul.f32 %v3126_v62, %v2194_v39  ;;  %v3128_v47 = vpop.eup %3127 }
0x1c35   :  { %v2190_v14 = vadd.f32 1.0, %v3128_v47  ;;  %v2424_v47 = vld [vmem:[%s4004_s9 + $0x10] sm:$0xff] }
0x1c36   :  { %2199 = vrot.lane.b32.xlu1 %v2197_v10, %s3198_s3 }
0x1c37   :  { %3129 = vrcp.f32 %v2190_v14  ;;  %v2425_v14 = vld [vmem:[%s4004_s9 + $0x18] sm:$0xff] }
0x1c41   :  { %v3130_v5 = vpop.eup %3129 }
0x1ca8   :  { %v2200_v63 = vpop.permute.xlu1 %2199 }
0x1ca9   :  { %v2202_v4 = vadd.f32 %v2200_v63, %v2196_v6  ;;  %v2943_v63 = vpack.c.bf16 %v2425_v14, %v2424_v47 }
0x1cab   :  { %3131 = vtanh.f32 %v2202_v4  ;;  %v2314_v20 = vrot.slane %v2202_v4, 6  ;;  %v2564_v4 = vld [vmem:[#allocation7] ss:$0 sm:$0xff] }
0x1cb5   :  { %v3132_v30 = vpop.eup %3131 }
0x1cb6   :  { %v2204_v13 = vmul.f32 %v3132_v30, %v3130_v5 }
0x1cb8   :  { %v2214_v43 = vrot.slane %v2204_v13, 4 }
0x1cba   :  { %2215 = vrot.lane.b32.xlu0 %v2214_v43, %s3198_s3  ;;  %v2565_v43 = vld [vmem:[#allocation4] ss:$0 sm:$0xff] }
0x1d2c   :  { %v2216_v8 = vpop.permute.xlu0 %2215 }
0x1d2d   :  { %2561 = vmatmul.mubr.msk.f32.vlgmr.msra.gmra.mrb[22].mxu1 %vm233_vm5, %v2216_v8 }
0x1d2e   :  { %2632 = vmatprep.mubr.msk.f32.mxu1 %vm3200_vm12, %v3197_v1  ;;  %v2423_v1 = vld [vmem:[%s4004_s9 + $0x8] sm:$0xff] }
0x1d2f   :  { %v2940_v34 = vpack.c.bf16 %v2423_v1, %v2422_v21 }
0x1d31   :  { %2941 = vmatpush3.bf16.msra.mxu1 %v2940_v34 }
0x1d32   :  { %2942 = vmatprep.subr.bf16.mxu1 %v3199_v51 }
0x1d35   :  { %2944 = vmatpush3.bf16.msra.mxu1 %v2943_v63 }
0x1e00   :  { %v2285_v25 = vpop.f32.mrb[22].mxu1 }
0x1e01   :  { %v2292_v42 = vrot.slane %v2285_v25, 2  ;;  %v2287_v50 = vpop.f32.mrb[23].mxu1 }
0x1e02   :  { %v2293_v57 = vrot.slane %v2287_v50, 2 }
0x1e03   :  { %v2296_v58 = vadd.f32 %v2292_v42, %v3793_v54  ;;  %v2334_v54 = vld [vmem:[%s4002_s7 + $0x40] sm:$0xff] }
0x1e04   :  { %v2297_v60 = vadd.f32 %v2293_v57, %v3797_v56  ;;  %v2336_v56 = vld [vmem:[%s4002_s7 + $0x50] sm:$0xff] }
0x1e05   :  { %v2298_v49 = vadd.f32 %v2296_v58, %v3752_v23  ;;  %v2335_v23 = vld [vmem:[%s4002_s7 + $0x48] sm:$0xff]  ;;  %v2931_v48 = vpack.c.bf16 %v2337_v26, %v2336_v56 }
0x1e06   :  { %v2299_v24 = vadd.f32 %v2297_v60, %v3803_v55  ;;  %v2928_v55 = vpack.c.bf16 %v2335_v23, %v2334_v54 }
0x1e07   :  { %v2562_v31 = vmul.f32 -1.442695, %v2298_v49 }
0x1e08   :  { %2929 = vmatpush3.bf16.msra.mxu0 %v2928_v55  ;;  %v2563_v17 = vmul.f32 -1.442695, %v2299_v24 }
0x1e09   :  { %3133 = vpow2.f32 %v2562_v31  ;;  %2930 = vmatprep.subr.bf16.mxu0 %v3199_v51 }
0x1e0a   :  { %3135 = vtanh.f32 %v2299_v24 }
0x1e0c   :  { %2932 = vmatpush3.bf16.msra.mxu0 %v2931_v48 }
0x1e0d   :  { %2933 = vmatprep.subr.bf16.mxu0 %v3199_v51 }
0x1e10   :  { %2935 = vmatpush3.bf16.msra.mxu0 %v2934_v19 }
0x1e11   :  { %2936 = vmatprep.subr.bf16.mxu0 %v3199_v51 }
0x1e13   :  { %v3134_v22 = vpop.eup %3133 }
0x1e14   :  { %v2303_v44 = vadd.f32 1.0, %v3134_v22  ;;  %v3136_v52 = vpop.eup %3135  ;;  %2938 = vmatpush3.bf16.msra.mxu0 %v2937_v41 }
0x1e16   :  { %3137 = vrcp.f32 %v2303_v44 }
0x1e17   :  { %3139 = vpow2.f32 %v2563_v17 }
0x1e20   :  { %v3138_v38 = vpop.eup %3137 }
0x1e21   :  { %v2317_v7 = vmul.f32 %v3138_v38, %v3136_v52  ;;  %v2316_v32 = vmul.f32 %v3138_v38, %v2314_v20  ;;  %v3140_v45 = vpop.eup %3139 }
0x1e22   :  { %v2310_v18 = vadd.f32 1.0, %v3140_v45 }
0x1e23   :  { %2319 = vrot.lane.b32.xlu1 %v2317_v7, %s3198_s3 }
0x1e24   :  { %3141 = vrcp.f32 %v2310_v18 }
0x1e2e   :  { %v3142_v39 = vpop.eup %3141 }
0x1e95   :  { %v2320_v53 = vpop.permute.xlu1 %2319 }
0x1e96   :  { %v2322_v59 = vadd.f32 %v2320_v53, %v2316_v32 }
0x1e98   :  { %3143 = vtanh.f32 %v2322_v59 }
0x1ea2   :  { %v3144_v62 = vpop.eup %3143 }
0x1ea3   :  { %v2324_v10 = vmul.f32 %v3144_v62, %v3142_v39 }
0x1ea5   :  { %v2325_v6 = vsel %vm233_vm5, %v3703_v61, %v2324_v10 }
0x1ea6   :  { %v2350_v28 = vrot.slane %v2325_v6, 6 }
0x1ea8   :  { %2622 = vmatmul.mubr.f32.vlgmr.msra.gmra.mrb[16].mxu0 %v2350_v28 }
0x1f7b   :  { %v2418_v5 = vpop.f32.mrb[16].mxu0 }
0x1f7c   :  { %v2419_v30 = vadd.f32 %v2564_v4, %v2418_v5  ;;  %v2623_v13 = vpop.f32.mrb[17].mxu0 }
0x1f7e   :  { %2633 = vmatmul.mubr.msk.f32.vlgmr.msra.gmra.mrb[24].mxu1 %vm133_vm0, %v2419_v30 }
0x2051   :  { %v2502_v61 = vpop.f32.mrb[24].mxu1 }
0x2052   :  { %v2503_v8 = vadd.f32 %v2565_v43, %v2502_v61  ;;  %v2634_v9 = vpop.f32.mrb[25].mxu1 }
0x2054   :  { %2507 = vst.msk [vmem:[%s4006_s11] sm:$0x3] %vm2506_vm13, %v2503_v8 }
0x2055   :  { %2512 = vsyncpa [#allocation6], 1 }
0x2056   :  { %2513 = vsyncpa [#allocation8], 1 }

</bundles_post_ra>
